<compile_context>
chip_gen: v7x
topology: tpu7x:2x2x1
jax: 0.10.0
libtpu: 0.0.40
codegen_flags: <defaults>
</compile_context>

<pallas_src>
import functools

import jax
import jax.numpy as jnp
import numpy as np
from jax.experimental import pallas as pl
from jax.experimental.pallas import tpu as pltpu


# ------------------------------ fused kernel ------------------------------

def _decoder_block_kernel(
    x_ref,        # (N*Hin, Win*Cin)        bf16  input rows (lane = x*Cin + ci)
    wup_ref,      # (Win*Cin, 2*Wout*Ch)    bf16  fused upconv weight (even|odd lanes)
    upb_ref,      # (1, 2*Wout*Ch)          f32   upconv bias tiled over lanes
    wb1_ref,      # (3*2*Wout*Ch, 2*Wout*Co)   bf16  conv1 pair-banded weight
    g1_ref,       # (1, 2*Wout*Co)          f32   BN1 gamma tiled over lanes
    b1_ref,       # (1, 2*Wout*Co)          f32   BN1 beta  tiled over lanes
    wb2_ref,      # (3*2*Wout*Co, 2*Wout*Co)   bf16  conv2 pair-banded weight
    g2_ref,       # (1, 2*Wout*Co)          f32
    b2_ref,       # (1, 2*Wout*Co)          f32
    o_ref,        # (N*Hin, 2*Wout*Co)      bf16  pair-row output (lane-dense)
    *, hin, cout,
):
    f32, bf16 = jnp.float32, jnp.bfloat16
    rows = o_ref.shape[0]                       # N*Hin pair rows

    # ---- ConvTranspose2d(Cin, Cin//2, k=2, s=2): ONE fused MXU matmul.  The even /
    #      odd output rows land in the low / high lane halves (pair-row layout), so the
    #      sub-pixel shuffle needs no scatter at all.
    up = jnp.dot(x_ref[...], wup_ref[...], preferred_element_type=f32) + upb_ref[...]

    # Per-image top / bottom pair-row masks for the vertical conv taps.
    row_id = jax.lax.broadcasted_iota(jnp.int32, (rows, 1), 0)
    is_top = (row_id % hin) == 0
    is_bot = (row_id % hin) == (hin - 1)

    def lane_allreduce(v):
        # log2(2*Wout) roll-and-add butterfly across lane groups of stride `cout`
        # (XLU/VPU, no MXU); every lane ends up holding its channel's total sum.
        shift = cout
        while shift < v.shape[-1]:
            v = v + pltpu.roll(v, shift=shift, axis=1)
            shift *= 2
        return v

    def conv3x3_bn_relu(h, wb_ref, g_ref, b_ref):
        # 3x3 conv, pad=1: vertical neighbours via sublane roll + edge mask (off the
        # MXU); horizontal taps + zero padding live in the banded weight -> ONE matmul.
        h_prev = jnp.where(is_top, 0.0, pltpu.roll(h, shift=1, axis=0))          # pair y-1
        h_next = jnp.where(is_bot, 0.0, pltpu.roll(h, shift=rows - 1, axis=0))   # pair y+1
        patches = jnp.concatenate(
            [h_prev.astype(bf16), h.astype(bf16), h_next.astype(bf16)], axis=-1)
        acc = jnp.dot(patches, wb_ref[...], preferred_element_type=f32)  # (rows, 2*W*Co)

        # BatchNorm2d (training-mode batch stats over all N*H*W, per channel) + ReLU.
        # Conv bias before BN is exactly absorbed by the mean subtraction -> dropped.
        inv_n = 1.0 / (rows * (acc.shape[-1] // cout))
        mean = jnp.sum(lane_allreduce(acc), axis=0, keepdims=True) * inv_n
        centered = acc - mean
        var = jnp.sum(lane_allreduce(centered * centered), axis=0, keepdims=True) * inv_n
        scale = g_ref[...] * jax.lax.rsqrt(var + 1e-5)
        return jnp.maximum(centered * scale + b_ref[...], 0.0)

    h1 = conv3x3_bn_relu(up, wb1_ref, g1_ref, b1_ref)
    h2 = conv3x3_bn_relu(h1, wb2_ref, g2_ref, b2_ref)
    o_ref[...] = h2.astype(o_ref.dtype)


# ----------------- structured weights (host-side, once per update) -----------------

def _pair_banded_conv3x3(w, width):
    """Conv2d(3x3, s=1, p=1) weights (Co, Ci, 3, 3) -> banded matrix for the pair-row
    layout.  Patch lanes: [prev | cur | next] pair, each r2*W*Ci + x*Ci + ci; output
    lanes: q2*W*Co + x*Co + co.  Returns (3*2*W*Ci, 2*W*Co)."""
    co_n, ci_n = w.shape[0], w.shape[1]
    wb = np.zeros((3, 2, width, ci_n, 2, width, co_n), np.float32)
    for q2 in range(2):
        for ky in range(3):
            d = q2 + ky - 1                   # image-row offset relative to row 2p
            kblk, r2p = d // 2 + 1, d % 2     # source pair block (prev/cur/next), parity
            for kx in range(3):
                tap = w[:, :, ky, kx].T       # (Ci, Co)
                for xo in range(width):
                    xi = xo + kx - 1
                    if 0 <= xi < width:
                        wb[kblk, r2p, xi, :, q2, xo, :] = tap
    return wb.reshape(3 * 2 * width * ci_n, 2 * width * co_n)


def prepare_decoder_params(params, in_width):
    """Build the structured kernel weights ONCE per parameter update (host-side numpy,
    outside jit) so no scatter construction sits on the per-step path."""
    up_w = np.asarray(params["up_w"], np.float32)        # (Cin, Ch, 2, 2)
    cin, ch = up_w.shape[0], up_w.shape[1]
    win, wout = in_width, 2 * in_width
    c1_w = np.asarray(params["c1_w"], np.float32)        # (Cout, Ch, 3, 3)
    c2_w = np.asarray(params["c2_w"], np.float32)        # (Cout, Cout, 3, 3)
    cout = c1_w.shape[0]

    # Fused ConvTranspose2d(k=2,s=2) weight: (Win*Cin, 2*Wout*Ch), even|odd lane halves.
    wup = np.zeros((win, cin, 2, wout, ch), np.float32)
    for di in range(2):
        for dj in range(2):
            for xin in range(win):
                wup[xin, :, di, 2 * xin + dj, :] = up_w[:, :, di, dj]
    wup = wup.reshape(win * cin, 2 * wout * ch)
    upb = np.tile(np.asarray(params["up_b"], np.float32), 2 * wout)[None, :]

    wb1 = _pair_banded_conv3x3(c1_w, wout)
    wb2 = _pair_banded_conv3x3(c2_w, wout)

    # BN affine params pre-tiled over lanes (period = Cout) -> no in-kernel broadcast.
    # NOTE: params["c1_b"] / params["c2_b"] are intentionally unused: a per-channel
    # constant added before training-mode BatchNorm is exactly cancelled by the mean
    # subtraction, so dropping it preserves the module's forward semantics.
    def lane_tile(v):
        return np.tile(np.asarray(v, np.float32), 2 * wout)[None, :]

    return {
        "wup": jnp.asarray(wup, jnp.bfloat16),
        "upb": jnp.asarray(upb, jnp.float32),
        "wb1": jnp.asarray(wb1, jnp.bfloat16),
        "g1": jnp.asarray(lane_tile(params["bn1_g"])),
        "b1": jnp.asarray(lane_tile(params["bn1_b"])),
        "wb2": jnp.asarray(wb2, jnp.bfloat16),
        "g2": jnp.asarray(lane_tile(params["bn2_g"])),
        "b2": jnp.asarray(lane_tile(params["bn2_b"])),
        "_cout": cout,  # static metadata (popped before jit use)
    }


# -------------------------------- wrapper --------------------------------

def decoder_block_forward(x_nchw, prep):
    """DecoderBlock.forward with use_transpose_conv=True, use_skip=False (skip=None),
    use_batchnorm=True (BatchNorm in training mode => batch statistics).
    Returns bf16 NCHW (halved kernel HBM writeback; next block re-casts anyway)."""
    n, cin, hin, win = x_nchw.shape
    hout, wout = 2 * hin, 2 * win
    lanes_out = prep["g1"].shape[1]                     # 2*Wout*Cout
    cout = lanes_out // (2 * wout)
    assert prep["wup"].shape[0] == win * cin, "weights prepared for a different width"
    assert (2 * wout) & (2 * wout - 1) == 0, "lane butterfly needs 2*Wout power of two"
    # TODO(synk): non-power-of-two widths need a masked tail step in the lane butterfly.

    # NCHW -> lane-dense pair-row layout (N*Hin, Win*Cin); bf16 operands for the MXU.
    x_rows = (jnp.transpose(x_nchw, (0, 2, 3, 1))
              .reshape(n * hin, win * cin).astype(jnp.bfloat16))

    kernel = functools.partial(_decoder_block_kernel, hin=hin, cout=cout)
    vmem = pltpu.MemorySpace.VMEM
    out_rows = pl.pallas_call(
        kernel,
        out_shape=jax.ShapeDtypeStruct((n * hin, lanes_out), jnp.bfloat16),
        in_specs=[pl.BlockSpec(memory_space=vmem)] * 9,
        out_specs=pl.BlockSpec(memory_space=vmem),
        compiler_params=pltpu.CompilerParams(vmem_limit_bytes=32 * 1024 * 1024),
    )(x_rows, prep["wup"], prep["upb"], prep["wb1"], prep["g1"], prep["b1"],
      prep["wb2"], prep["g2"], prep["b2"])

    # Pair-row lanes [even row | odd row] flatten straight into NHWC, then NCHW.
    out_nhwc = out_rows.reshape(n, hout, wout, cout)
    return jnp.transpose(out_nhwc, (0, 3, 1, 2))


# ------------------------ deterministic parameters ------------------------

def init_params(key, in_channels, out_channels):
    ch = in_channels // 2
    ks = jax.random.split(key, 6)
    return {
        # ConvTranspose2d(in_channels, in_channels//2, kernel_size=2, stride=2)
        "up_w": 0.1 * jax.random.normal(ks[0], (in_channels, ch, 2, 2), jnp.float32),
        "up_b": 0.1 * jax.random.normal(ks[1], (ch,), jnp.float32),
        # DoubleConvBlock conv1: Conv2d(ch, out_channels, 3, 1, 1) + BN + ReLU
        "c1_w": 0.1 * jax.random.normal(ks[2], (out_channels, ch, 3, 3), jnp.float32),
        "c1_b": 0.1 * jax.random.normal(ks[3], (out_channels,), jnp.float32),
        "bn1_g": jnp.ones((out_channels,), jnp.float32),
        "bn1_b": jnp.zeros((out_channels,), jnp.float32),
        # DoubleConvBlock conv2: Conv2d(out_channels, out_channels, 3, 1, 1) + BN + ReLU
        "c2_w": 0.1 * jax.random.normal(ks[4], (out_channels, out_channels, 3, 3),
                                        jnp.float32),
        "c2_b": 0.1 * jax.random.normal(ks[5], (out_channels,), jnp.float32),
        "bn2_g": jnp.ones((out_channels,), jnp.float32),
        "bn2_b": jnp.zeros((out_channels,), jnp.float32),
    }


if __name__ == "__main__":
    key = jax.random.PRNGKey(0)
    kx, kp = jax.random.split(key)

    in_channels, out_channels = 16, 8
    x = jax.random.normal(kx, (2, in_channels, 8, 8), jnp.float32)   # NCHW
    params = init_params(kp, in_channels, out_channels)

    prep = prepare_decoder_params(params, in_width=x.shape[-1])      # once per update
    prep.pop("_cout")                                                # static metadata

    out = jax.jit(decoder_block_forward)(x, prep)
    out = jax.block_until_ready(out)
    assert out.shape == (2, out_channels, 16, 16), out.shape
    assert bool(jnp.all(jnp.isfinite(out.astype(jnp.float32))))
    print("KERNEL_OK")
</pallas_src>

<mosaic_0001>
module attributes {stable_mosaic.version = 11 : i64} {
  func.func @_decoder_block_kernel(%arg0: memref<16x128xbf16, #tpu.memory_space<vmem>>, %arg1: memref<128x256xbf16, #tpu.memory_space<vmem>>, %arg2: memref<1x256xf32, #tpu.memory_space<vmem>>, %arg3: memref<768x256xbf16, #tpu.memory_space<vmem>>, %arg4: memref<1x256xf32, #tpu.memory_space<vmem>>, %arg5: memref<1x256xf32, #tpu.memory_space<vmem>>, %arg6: memref<768x256xbf16, #tpu.memory_space<vmem>>, %arg7: memref<1x256xf32, #tpu.memory_space<vmem>>, %arg8: memref<1x256xf32, #tpu.memory_space<vmem>>, %arg9: memref<16x256xbf16, #tpu.memory_space<vmem>>) attributes {dimension_semantics = [], scalar_prefetch = 0 : i64, scratch_operands = 0 : i64, tpu.core_type = #tpu.core_type<tc>} {
    %c0 = arith.constant 0 : index
    %c0_0 = arith.constant 0 : index
    %0 = vector.load %arg0[%c0, %c0_0] : memref<16x128xbf16, #tpu.memory_space<vmem>>, vector<16x128xbf16>
    %c0_1 = arith.constant 0 : index
    %c0_2 = arith.constant 0 : index
    %1 = vector.load %arg1[%c0_1, %c0_2] : memref<128x256xbf16, #tpu.memory_space<vmem>>, vector<128x256xbf16>
    %cst = arith.constant dense<0.000000e+00> : vector<16x256xf32>
    %2 = tpu.matmul %0, %1, %cst {dimension_numbers = #tpu.dot_dimension_numbers<[1], [0], [0], [1], [0, 0, 1, 1], [], []>} : vector<16x128xbf16>, vector<128x256xbf16>, vector<16x256xf32> -> vector<16x256xf32>
    %c0_3 = arith.constant 0 : index
    %c0_4 = arith.constant 0 : index
    %3 = vector.load %arg2[%c0_3, %c0_4] : memref<1x256xf32, #tpu.memory_space<vmem>>, vector<1x256xf32>
    %4 = vector.broadcast %3 : vector<1x256xf32> to vector<16x256xf32>
    %5 = arith.addf %2, %4 : vector<16x256xf32>
    %6 = tpu.iota {dimensions = array<i32: 0>} : vector<16x1xi32>
    %c8_i32 = arith.constant 8 : i32
    %c0_i32 = arith.constant 0 : i32
    %7 = arith.cmpi eq, %c8_i32, %c0_i32 : i32
    %c1_i32 = arith.constant 1 : i32
    %8 = arith.select %7, %c1_i32, %c8_i32 : i32
    %9 = vector.broadcast %8 : i32 to vector<16x1xi32>
    %10 = arith.remsi %6, %9 : vector<16x1xi32>
    %c0_i32_5 = arith.constant 0 : i32
    %11 = vector.broadcast %c0_i32_5 : i32 to vector<16x1xi32>
    %12 = arith.cmpi ne, %10, %11 : vector<16x1xi32>
    %c0_i32_6 = arith.constant 0 : i32
    %13 = vector.broadcast %c0_i32_6 : i32 to vector<16x1xi32>
    %14 = arith.cmpi slt, %10, %13 : vector<16x1xi32>
    %c0_i32_7 = arith.constant 0 : i32
    %15 = arith.cmpi slt, %8, %c0_i32_7 : i32
    %16 = vector.broadcast %15 : i1 to vector<16x1xi1>
    %17 = vector.broadcast %16 : vector<16x1xi1> to vector<16x1xi1>
    %18 = arith.xori %14, %17 : vector<16x1xi1>
    %19 = arith.andi %18, %12 : vector<16x1xi1>
    %20 = vector.broadcast %8 : i32 to vector<16x1xi32>
    %21 = arith.addi %10, %20 : vector<16x1xi32>
    %22 = arith.select %19, %21, %10 : vector<16x1xi1>, vector<16x1xi32>
    %c0_i32_8 = arith.constant 0 : i32
    %23 = vector.broadcast %c0_i32_8 : i32 to vector<16x1xi32>
    %24 = arith.cmpi eq, %22, %23 : vector<16x1xi32>
    %c8_i32_9 = arith.constant 8 : i32
    %c0_i32_10 = arith.constant 0 : i32
    %25 = arith.cmpi eq, %c8_i32_9, %c0_i32_10 : i32
    %c1_i32_11 = arith.constant 1 : i32
    %26 = arith.select %25, %c1_i32_11, %c8_i32_9 : i32
    %27 = vector.broadcast %26 : i32 to vector<16x1xi32>
    %28 = arith.remsi %6, %27 : vector<16x1xi32>
    %c0_i32_12 = arith.constant 0 : i32
    %29 = vector.broadcast %c0_i32_12 : i32 to vector<16x1xi32>
    %30 = arith.cmpi ne, %28, %29 : vector<16x1xi32>
    %c0_i32_13 = arith.constant 0 : i32
    %31 = vector.broadcast %c0_i32_13 : i32 to vector<16x1xi32>
    %32 = arith.cmpi slt, %28, %31 : vector<16x1xi32>
    %c0_i32_14 = arith.constant 0 : i32
    %33 = arith.cmpi slt, %26, %c0_i32_14 : i32
    %34 = vector.broadcast %33 : i1 to vector<16x1xi1>
    %35 = vector.broadcast %34 : vector<16x1xi1> to vector<16x1xi1>
    %36 = arith.xori %32, %35 : vector<16x1xi1>
    %37 = arith.andi %36, %30 : vector<16x1xi1>
    %38 = vector.broadcast %26 : i32 to vector<16x1xi32>
    %39 = arith.addi %28, %38 : vector<16x1xi32>
    %40 = arith.select %37, %39, %28 : vector<16x1xi1>, vector<16x1xi32>
    %c7_i32 = arith.constant 7 : i32
    %41 = vector.broadcast %c7_i32 : i32 to vector<16x1xi32>
    %42 = arith.cmpi eq, %40, %41 : vector<16x1xi32>
    %c1_i32_15 = arith.constant 1 : i32
    %43 = tpu.dynamic_rotate %5 by %c1_i32_15 dim 0 : vector<16x256xf32>, i32 -> vector<16x256xf32>
    %cst_16 = arith.constant 0.000000e+00 : f32
    %44 = vector.shape_cast %24 : vector<16x1xi1> to vector<16x1xi1>
    %45 = vector.broadcast %44 : vector<16x1xi1> to vector<16x256xi1>
    %46 = vector.broadcast %cst_16 : f32 to vector<16x256xf32>
    %47 = arith.select %45, %46, %43 : vector<16x256xi1>, vector<16x256xf32>
    %c15_i32 = arith.constant 15 : i32
    %48 = tpu.dynamic_rotate %5 by %c15_i32 dim 0 : vector<16x256xf32>, i32 -> vector<16x256xf32>
    %cst_17 = arith.constant 0.000000e+00 : f32
    %49 = vector.shape_cast %42 : vector<16x1xi1> to vector<16x1xi1>
    %50 = vector.broadcast %49 : vector<16x1xi1> to vector<16x256xi1>
    %51 = vector.broadcast %cst_17 : f32 to vector<16x256xf32>
    %52 = arith.select %50, %51, %48 : vector<16x256xi1>, vector<16x256xf32>
    %53 = arith.truncf %47 : vector<16x256xf32> to vector<16x256xbf16>
    %54 = arith.truncf %5 : vector<16x256xf32> to vector<16x256xbf16>
    %55 = arith.truncf %52 : vector<16x256xf32> to vector<16x256xbf16>
    %56 = tpu.concatenate %53, %54, %55 in 1 : vector<16x256xbf16>, vector<16x256xbf16>, vector<16x256xbf16> -> vector<16x768xbf16>
    %c0_18 = arith.constant 0 : index
    %c0_19 = arith.constant 0 : index
    %57 = vector.load %arg3[%c0_18, %c0_19] : memref<768x256xbf16, #tpu.memory_space<vmem>>, vector<768x256xbf16>
    %cst_20 = arith.constant dense<0.000000e+00> : vector<16x256xf32>
    %58 = tpu.matmul %56, %57, %cst_20 {dimension_numbers = #tpu.dot_dimension_numbers<[1], [0], [0], [1], [0, 0, 1, 1], [], []>} : vector<16x768xbf16>, vector<768x256xbf16>, vector<16x256xf32> -> vector<16x256xf32>
    %c8_i32_21 = arith.constant 8 : i32
    %59 = tpu.dynamic_rotate %58 by %c8_i32_21 dim 1 : vector<16x256xf32>, i32 -> vector<16x256xf32>
    %60 = arith.addf %58, %59 : vector<16x256xf32>
    %c16_i32 = arith.constant 16 : i32
    %61 = tpu.dynamic_rotate %60 by %c16_i32 dim 1 : vector<16x256xf32>, i32 -> vector<16x256xf32>
    %62 = arith.addf %60, %61 : vector<16x256xf32>
    %c32_i32 = arith.constant 32 : i32
    %63 = tpu.dynamic_rotate %62 by %c32_i32 dim 1 : vector<16x256xf32>, i32 -> vector<16x256xf32>
    %64 = arith.addf %62, %63 : vector<16x256xf32>
    %c64_i32 = arith.constant 64 : i32
    %65 = tpu.dynamic_rotate %64 by %c64_i32 dim 1 : vector<16x256xf32>, i32 -> vector<16x256xf32>
    %66 = arith.addf %64, %65 : vector<16x256xf32>
    %c128_i32 = arith.constant 128 : i32
    %67 = tpu.dynamic_rotate %66 by %c128_i32 dim 1 : vector<16x256xf32>, i32 -> vector<16x256xf32>
    %68 = arith.addf %66, %67 : vector<16x256xf32>
    %cst_22 = arith.constant dense<0.000000e+00> : vector<256xf32>
    %69 = vector.multi_reduction <add>, %68, %cst_22 [0] : vector<16x256xf32> to vector<256xf32>
    %70 = vector.shape_cast %69 : vector<256xf32> to vector<1x256xf32>
    %cst_23 = arith.constant 0.001953125 : f32
    %71 = vector.broadcast %cst_23 : f32 to vector<1x256xf32>
    %72 = arith.mulf %70, %71 : vector<1x256xf32>
    %73 = vector.broadcast %72 : vector<1x256xf32> to vector<16x256xf32>
    %74 = arith.subf %58, %73 : vector<16x256xf32>
    %75 = arith.mulf %74, %74 : vector<16x256xf32>
    %c8_i32_24 = arith.constant 8 : i32
    %76 = tpu.dynamic_rotate %75 by %c8_i32_24 dim 1 : vector<16x256xf32>, i32 -> vector<16x256xf32>
    %77 = arith.addf %75, %76 : vector<16x256xf32>
    %c16_i32_25 = arith.constant 16 : i32
    %78 = tpu.dynamic_rotate %77 by %c16_i32_25 dim 1 : vector<16x256xf32>, i32 -> vector<16x256xf32>
    %79 = arith.addf %77, %78 : vector<16x256xf32>
    %c32_i32_26 = arith.constant 32 : i32
    %80 = tpu.dynamic_rotate %79 by %c32_i32_26 dim 1 : vector<16x256xf32>, i32 -> vector<16x256xf32>
    %81 = arith.addf %79, %80 : vector<16x256xf32>
    %c64_i32_27 = arith.constant 64 : i32
    %82 = tpu.dynamic_rotate %81 by %c64_i32_27 dim 1 : vector<16x256xf32>, i32 -> vector<16x256xf32>
    %83 = arith.addf %81, %82 : vector<16x256xf32>
    %c128_i32_28 = arith.constant 128 : i32
    %84 = tpu.dynamic_rotate %83 by %c128_i32_28 dim 1 : vector<16x256xf32>, i32 -> vector<16x256xf32>
    %85 = arith.addf %83, %84 : vector<16x256xf32>
    %cst_29 = arith.constant dense<0.000000e+00> : vector<256xf32>
    %86 = vector.multi_reduction <add>, %85, %cst_29 [0] : vector<16x256xf32> to vector<256xf32>
    %87 = vector.shape_cast %86 : vector<256xf32> to vector<1x256xf32>
    %cst_30 = arith.constant 0.001953125 : f32
    %88 = vector.broadcast %cst_30 : f32 to vector<1x256xf32>
    %89 = arith.mulf %87, %88 : vector<1x256xf32>
    %c0_31 = arith.constant 0 : index
    %c0_32 = arith.constant 0 : index
    %90 = vector.load %arg4[%c0_31, %c0_32] : memref<1x256xf32, #tpu.memory_space<vmem>>, vector<1x256xf32>
    %cst_33 = arith.constant 9.99999974E-6 : f32
    %91 = vector.broadcast %cst_33 : f32 to vector<1x256xf32>
    %92 = arith.addf %89, %91 : vector<1x256xf32>
    %93 = math.rsqrt %92 : vector<1x256xf32>
    %94 = arith.mulf %90, %93 : vector<1x256xf32>
    %95 = vector.broadcast %94 : vector<1x256xf32> to vector<16x256xf32>
    %96 = arith.mulf %74, %95 : vector<16x256xf32>
    %c0_34 = arith.constant 0 : index
    %c0_35 = arith.constant 0 : index
    %97 = vector.load %arg5[%c0_34, %c0_35] : memref<1x256xf32, #tpu.memory_space<vmem>>, vector<1x256xf32>
    %98 = vector.broadcast %97 : vector<1x256xf32> to vector<16x256xf32>
    %99 = arith.addf %96, %98 : vector<16x256xf32>
    %cst_36 = arith.constant 0.000000e+00 : f32
    %100 = vector.broadcast %cst_36 : f32 to vector<16x256xf32>
    %101 = arith.maximumf %99, %100 : vector<16x256xf32>
    %c1_i32_37 = arith.constant 1 : i32
    %102 = tpu.dynamic_rotate %101 by %c1_i32_37 dim 0 : vector<16x256xf32>, i32 -> vector<16x256xf32>
    %cst_38 = arith.constant 0.000000e+00 : f32
    %103 = vector.shape_cast %24 : vector<16x1xi1> to vector<16x1xi1>
    %104 = vector.broadcast %103 : vector<16x1xi1> to vector<16x256xi1>
    %105 = vector.broadcast %cst_38 : f32 to vector<16x256xf32>
    %106 = arith.select %104, %105, %102 : vector<16x256xi1>, vector<16x256xf32>
    %c15_i32_39 = arith.constant 15 : i32
    %107 = tpu.dynamic_rotate %101 by %c15_i32_39 dim 0 : vector<16x256xf32>, i32 -> vector<16x256xf32>
    %cst_40 = arith.constant 0.000000e+00 : f32
    %108 = vector.shape_cast %42 : vector<16x1xi1> to vector<16x1xi1>
    %109 = vector.broadcast %108 : vector<16x1xi1> to vector<16x256xi1>
    %110 = vector.broadcast %cst_40 : f32 to vector<16x256xf32>
    %111 = arith.select %109, %110, %107 : vector<16x256xi1>, vector<16x256xf32>
    %112 = arith.truncf %106 : vector<16x256xf32> to vector<16x256xbf16>
    %113 = arith.truncf %101 : vector<16x256xf32> to vector<16x256xbf16>
    %114 = arith.truncf %111 : vector<16x256xf32> to vector<16x256xbf16>
    %115 = tpu.concatenate %112, %113, %114 in 1 : vector<16x256xbf16>, vector<16x256xbf16>, vector<16x256xbf16> -> vector<16x768xbf16>
    %c0_41 = arith.constant 0 : index
    %c0_42 = arith.constant 0 : index
    %116 = vector.load %arg6[%c0_41, %c0_42] : memref<768x256xbf16, #tpu.memory_space<vmem>>, vector<768x256xbf16>
    %cst_43 = arith.constant dense<0.000000e+00> : vector<16x256xf32>
    %117 = tpu.matmul %115, %116, %cst_43 {dimension_numbers = #tpu.dot_dimension_numbers<[1], [0], [0], [1], [0, 0, 1, 1], [], []>} : vector<16x768xbf16>, vector<768x256xbf16>, vector<16x256xf32> -> vector<16x256xf32>
    %c8_i32_44 = arith.constant 8 : i32
    %118 = tpu.dynamic_rotate %117 by %c8_i32_44 dim 1 : vector<16x256xf32>, i32 -> vector<16x256xf32>
    %119 = arith.addf %117, %118 : vector<16x256xf32>
    %c16_i32_45 = arith.constant 16 : i32
    %120 = tpu.dynamic_rotate %119 by %c16_i32_45 dim 1 : vector<16x256xf32>, i32 -> vector<16x256xf32>
    %121 = arith.addf %119, %120 : vector<16x256xf32>
    %c32_i32_46 = arith.constant 32 : i32
    %122 = tpu.dynamic_rotate %121 by %c32_i32_46 dim 1 : vector<16x256xf32>, i32 -> vector<16x256xf32>
    %123 = arith.addf %121, %122 : vector<16x256xf32>
    %c64_i32_47 = arith.constant 64 : i32
    %124 = tpu.dynamic_rotate %123 by %c64_i32_47 dim 1 : vector<16x256xf32>, i32 -> vector<16x256xf32>
    %125 = arith.addf %123, %124 : vector<16x256xf32>
    %c128_i32_48 = arith.constant 128 : i32
    %126 = tpu.dynamic_rotate %125 by %c128_i32_48 dim 1 : vector<16x256xf32>, i32 -> vector<16x256xf32>
    %127 = arith.addf %125, %126 : vector<16x256xf32>
    %cst_49 = arith.constant dense<0.000000e+00> : vector<256xf32>
    %128 = vector.multi_reduction <add>, %127, %cst_49 [0] : vector<16x256xf32> to vector<256xf32>
    %129 = vector.shape_cast %128 : vector<256xf32> to vector<1x256xf32>
    %cst_50 = arith.constant 0.001953125 : f32
    %130 = vector.broadcast %cst_50 : f32 to vector<1x256xf32>
    %131 = arith.mulf %129, %130 : vector<1x256xf32>
    %132 = vector.broadcast %131 : vector<1x256xf32> to vector<16x256xf32>
    %133 = arith.subf %117, %132 : vector<16x256xf32>
    %134 = arith.mulf %133, %133 : vector<16x256xf32>
    %c8_i32_51 = arith.constant 8 : i32
    %135 = tpu.dynamic_rotate %134 by %c8_i32_51 dim 1 : vector<16x256xf32>, i32 -> vector<16x256xf32>
    %136 = arith.addf %134, %135 : vector<16x256xf32>
    %c16_i32_52 = arith.constant 16 : i32
    %137 = tpu.dynamic_rotate %136 by %c16_i32_52 dim 1 : vector<16x256xf32>, i32 -> vector<16x256xf32>
    %138 = arith.addf %136, %137 : vector<16x256xf32>
    %c32_i32_53 = arith.constant 32 : i32
    %139 = tpu.dynamic_rotate %138 by %c32_i32_53 dim 1 : vector<16x256xf32>, i32 -> vector<16x256xf32>
    %140 = arith.addf %138, %139 : vector<16x256xf32>
    %c64_i32_54 = arith.constant 64 : i32
    %141 = tpu.dynamic_rotate %140 by %c64_i32_54 dim 1 : vector<16x256xf32>, i32 -> vector<16x256xf32>
    %142 = arith.addf %140, %141 : vector<16x256xf32>
    %c128_i32_55 = arith.constant 128 : i32
    %143 = tpu.dynamic_rotate %142 by %c128_i32_55 dim 1 : vector<16x256xf32>, i32 -> vector<16x256xf32>
    %144 = arith.addf %142, %143 : vector<16x256xf32>
    %cst_56 = arith.constant dense<0.000000e+00> : vector<256xf32>
    %145 = vector.multi_reduction <add>, %144, %cst_56 [0] : vector<16x256xf32> to vector<256xf32>
    %146 = vector.shape_cast %145 : vector<256xf32> to vector<1x256xf32>
    %cst_57 = arith.constant 0.001953125 : f32
    %147 = vector.broadcast %cst_57 : f32 to vector<1x256xf32>
    %148 = arith.mulf %146, %147 : vector<1x256xf32>
    %c0_58 = arith.constant 0 : index
    %c0_59 = arith.constant 0 : index
    %149 = vector.load %arg7[%c0_58, %c0_59] : memref<1x256xf32, #tpu.memory_space<vmem>>, vector<1x256xf32>
    %cst_60 = arith.constant 9.99999974E-6 : f32
    %150 = vector.broadcast %cst_60 : f32 to vector<1x256xf32>
    %151 = arith.addf %148, %150 : vector<1x256xf32>
    %152 = math.rsqrt %151 : vector<1x256xf32>
    %153 = arith.mulf %149, %152 : vector<1x256xf32>
    %154 = vector.broadcast %153 : vector<1x256xf32> to vector<16x256xf32>
    %155 = arith.mulf %133, %154 : vector<16x256xf32>
    %c0_61 = arith.constant 0 : index
    %c0_62 = arith.constant 0 : index
    %156 = vector.load %arg8[%c0_61, %c0_62] : memref<1x256xf32, #tpu.memory_space<vmem>>, vector<1x256xf32>
    %157 = vector.broadcast %156 : vector<1x256xf32> to vector<16x256xf32>
    %158 = arith.addf %155, %157 : vector<16x256xf32>
    %cst_63 = arith.constant 0.000000e+00 : f32
    %159 = vector.broadcast %cst_63 : f32 to vector<16x256xf32>
    %160 = arith.maximumf %158, %159 : vector<16x256xf32>
    %161 = arith.truncf %160 : vector<16x256xf32> to vector<16x256xbf16>
    %c0_64 = arith.constant 0 : index
    %c0_65 = arith.constant 0 : index
    %162 = vector.load %arg9[%c0_64, %c0_65] : memref<16x256xbf16, #tpu.memory_space<vmem>>, vector<16x256xbf16>
    tpu.vector_store %arg9[%c0_64, %c0_65], %161 {strides = array<i32>} : memref<16x256xbf16, #tpu.memory_space<vmem>>, vector<16x256xbf16>,
    return
  }
}

</mosaic_0001>

<bundles_post_ra>
// kernel: decoder_block_forward.1
= control target key start
LH: loop header
LB: loop body
LE: loop exit
PB: predicated region body
PF: predicated region fallthrough
CT: control target
= control target key end

     0   :  { %14 = vsyncpa [#allocation3], 0  ;;  %s3443_s0 = inlined_call_operand.vmem [shape: bf16[16,128], index: 0, kind: input, shape index: {}]   ;;  %s3444_s1 = inlined_call_operand.vmem [shape: bf16[128,256], index: 1, kind: input, shape index: {}]   ;;  %s3445_s2 = inlined_call_operand.vmem [shape: f32[1,256], index: 2, kind: input, shape index: {}]   ;;  %s3446_s3 = inlined_call_operand.hbm [shape: bf16[768,256], index: 3, kind: input, shape index: {}]   ;;  %s3447_s4 = inlined_call_operand.vmem [shape: f32[1,256], index: 4, kind: input, shape index: {}]   ;;  %s3448_s5 = inlined_call_operand.vmem [shape: f32[1,256], index: 5, kind: input, shape index: {}]   ;;  %s3449_s6 = inlined_call_operand.hbm [shape: bf16[768,256], index: 6, kind: input, shape index: {}]   ;;  %s3450_s7 = inlined_call_operand.vmem [shape: f32[1,256], index: 7, kind: input, shape index: {}]   ;;  %s3451_s8 = inlined_call_operand.vmem [shape: f32[1,256], index: 8, kind: input, shape index: {}]   ;;  %s3452_s9 = inlined_call_operand.vmem [shape: bf16[16,256], index: 9, kind: output, shape index: {}]  }
   0x1   :  { %15 = vsyncpa [#allocation5], 0  ;;  %s2828_s30 = smov [#allocation2]   ;;  %s2780_s13 = scalar_lea.hbm %s3446_s3, 12288 }
   0x2   :  { %s27_s10 = sshll.u32 %s2828_s30, 4  ;;  %p2781_p0 = scmp.ne.s32.totalorder %s3446_s3, %s2780_s13  ;;  %s28_s10 = int_to_ptr.vmem [resolvable:$true] %s27_s10 }
   0x3   :  { %p2784_p1 = scmp.lt.u32.totalorder %s2780_s13, %s3446_s3 }
   0x5   :  { %p2786_p2 = pnand %p2784_p1, %p2781_p0 }
   0x7   :  { %2789 = shalt.err (!%p2786_p2)
}
   0x8   :  { %s2790_s18 = scalar_lea.vmem %s28_s10, 12288  ;;  %p2795_p4 = scmp.lt.s32.totalorder %s28_s10, %s28_s10 }
   0x9   :  { %p2791_p3 = scmp.ne.s32.totalorder %s28_s10, %s2790_s18  ;;  %p2796_p5 = scmp.lt.s32.totalorder %s2790_s18, %s2790_s18 }
   0xb   :  { %p2797_p6 = por %p2796_p5, %p2795_p4 }
   0xd   :  { %p2798_p7 = pnand %p2797_p6, %p2791_p3 }
   0xf   :  { %2801 = shalt.err (!%p2798_p7)
}
  0x10   :  { %s2829_s19 = smov 128   ;;  %s2830_s20 = smov 8  }
  0x11   :  { %33 = dma.hbm_to_vmem [thread:$0]  %s3446_s3, 12288, %s28_s10, [#allocation3], %s2829_s19, %s2829_s19, %s2830_s20  }
  0x12   :  { %s2831_s23 = smov [#allocation4]   ;;  %s2802_s27 = scalar_lea.hbm %s3449_s6, 12288 }
  0x13   :  { %s43_s24 = sshll.u32 %s2831_s23, 4  ;;  %p2803_p8 = scmp.ne.s32.totalorder %s3449_s6, %s2802_s27  ;;  %s44_s24 = int_to_ptr.vmem [resolvable:$true] %s43_s24 }
  0x14   :  { %p2806_p9 = scmp.lt.u32.totalorder %s2802_s27, %s3449_s6 }
  0x16   :  { %p2808_p10 = pnand %p2806_p9, %p2803_p8 }
  0x18   :  { %2811 = shalt.err (!%p2808_p10)
}
  0x19   :  { %s2812_s12 = scalar_lea.vmem %s44_s24, 12288  ;;  %p2817_p12 = scmp.lt.s32.totalorder %s44_s24, %s44_s24 }
  0x1a   :  { %p2813_p11 = scmp.ne.s32.totalorder %s44_s24, %s2812_s12  ;;  %p2818_p13 = scmp.lt.s32.totalorder %s2812_s12, %s2812_s12 }
  0x1c   :  { %p2819_p0 = por %p2818_p13, %p2817_p12 }
  0x1e   :  { %p2820_p1 = pnand %p2819_p0, %p2813_p11 }
  0x20   :  { %2823 = shalt.err (!%p2820_p1)
}
  0x21   :  { %49 = dma.hbm_to_vmem [thread:$0]  %s3449_s6, 12288, %s44_s24, [#allocation5], %s2829_s19, %s2829_s19, %s2830_s20  }
  0x22   :  { %2824 = dma.done.wait [#allocation3], 12288  }
  0x23   :  { %2825 = vsyncadd [#allocation3], 4294955008 }
  0x24   :  { %2826 = dma.done.wait [#allocation5], 12288  }
  0x25   :  { %2827 = vsyncadd [#allocation5], 4294955008  ;;  %v2832_v0 = vmov 0   ;;  %v2463_v1 = vld [vmem:[%s3444_s1 + $0x4] ss:$8 sps:$4 sm:$0xff]   ;;  %v81_v51 = vlaneseq  ;;  %s2834_s25 = smov 32  }
  0x26   :  { %209 = vmatprep.mubr.bf16.mxu0 %v2832_v0  ;;  %v2465_v2 = vld [vmem:[%s3444_s1] ss:$8 sps:$4 sm:$0xff]   ;;  %177 = vmatprep.subr.bf16.mxu0 %v2463_v1  ;;  %v2466_v3 = vld [vmem:[%s3444_s1 + $0x14] ss:$8 sps:$4 sm:$0xff]   ;;  %v2468_v4 = vld [vmem:[%s3444_s1 + $0x10] ss:$8 sps:$4 sm:$0xff]  }
  0x27   :  { %178 = vmatpush1.bf16.msra.mxu0 %v2465_v2  ;;  %v2469_v5 = vld [vmem:[%s3444_s1 + $0x24] ss:$8 sps:$4 sm:$0xff]   ;;  %v2471_v6 = vld [vmem:[%s3444_s1 + $0x20] ss:$8 sps:$4 sm:$0xff]   ;;  %v2472_v7 = vld [vmem:[%s3444_s1 + $0x34] ss:$8 sps:$4 sm:$0xff]  }
  0x28   :  { %179 = vmatprep.subr.bf16.mxu0 %v2466_v3  ;;  %v2474_v8 = vld [vmem:[%s3444_s1 + $0x30] ss:$8 sps:$4 sm:$0xff]   ;;  %v2475_v9 = vld [vmem:[%s3444_s1 + $0x44] ss:$8 sps:$4 sm:$0xff]   ;;  %v2490_v11 = vld [vmem:[#allocation2] ss:$8 sps:$4 sm:$0xff]  }
  0x29   :  { %v2488_v10 = vld [vmem:[#allocation2 + $0x4] ss:$8 sps:$4 sm:$0xff]   ;;  %v2491_v12 = vld [vmem:[#allocation2 + $0x14] ss:$8 sps:$4 sm:$0xff]   ;;  %v2477_v13 = vld [vmem:[%s3444_s1 + $0x40] ss:$8 sps:$4 sm:$0xff]  }
  0x2a   :  { %867 = vmatprep.subr.bf16.mxu1 %v2488_v10  ;;  %v2493_v14 = vld [vmem:[#allocation2 + $0x10] ss:$8 sps:$4 sm:$0xff]   ;;  %v2478_v15 = vld [vmem:[%s3444_s1 + $0x54] ss:$8 sps:$4 sm:$0xff]   ;;  %v2494_v16 = vld [vmem:[#allocation2 + $0x24] ss:$8 sps:$4 sm:$0xff]  }
  0x2b   :  { %180 = vmatpush1.bf16.msra.mxu0 %v2468_v4  ;;  %868 = vmatpush1.bf16.msra.mxu1 %v2490_v11  ;;  %v2480_v17 = vld [vmem:[%s3444_s1 + $0x50] ss:$8 sps:$4 sm:$0xff]   ;;  %v2496_v18 = vld [vmem:[#allocation2 + $0x20] ss:$8 sps:$4 sm:$0xff]   ;;  %v2481_v19 = vld [vmem:[%s3444_s1 + $0x64] ss:$8 sps:$4 sm:$0xff]  }
  0x2c   :  { %181 = vmatprep.subr.bf16.mxu0 %v2469_v5  ;;  %869 = vmatprep.subr.bf16.mxu1 %v2491_v12  ;;  %v2497_v20 = vld [vmem:[#allocation2 + $0x34] ss:$8 sps:$4 sm:$0xff]   ;;  %v2483_v21 = vld [vmem:[%s3444_s1 + $0x60] ss:$8 sps:$4 sm:$0xff]   ;;  %v2499_v22 = vld [vmem:[#allocation2 + $0x30] ss:$8 sps:$4 sm:$0xff]  }
  0x2d   :  { %v2484_v23 = vld [vmem:[%s3444_s1 + $0x74] ss:$8 sps:$4 sm:$0xff]   ;;  %v2500_v24 = vld [vmem:[#allocation2 + $0x44] ss:$8 sps:$4 sm:$0xff]   ;;  %v2486_v25 = vld [vmem:[%s3444_s1 + $0x70] ss:$8 sps:$4 sm:$0xff]  }
  0x2e   :  { %v2502_v26 = vld [vmem:[#allocation2 + $0x40] ss:$8 sps:$4 sm:$0xff]   ;;  %v2503_v28 = vld [vmem:[#allocation2 + $0x54] ss:$8 sps:$4 sm:$0xff]   ;;  %v2505_v29 = vld [vmem:[#allocation2 + $0x50] ss:$8 sps:$4 sm:$0xff]  }
  0x2f   :  { %182 = vmatpush1.bf16.msra.mxu0 %v2471_v6  ;;  %870 = vmatpush1.bf16.msra.mxu1 %v2493_v14  ;;  %v2487_v27 = vld [vmem:[%s3443_s0] sm:$0xff]   ;;  %v2509_v32 = vld [vmem:[#allocation2 + $0x74] ss:$8 sps:$4 sm:$0xff]   ;;  %v2511_v33 = vld [vmem:[#allocation2 + $0x70] ss:$8 sps:$4 sm:$0xff]   ;;  %v2965_v52 = vshrl.u32 %v81_v51, 7 }
  0x30   :  { %183 = vmatprep.subr.bf16.mxu0 %v2472_v7  ;;  %871 = vmatprep.subr.bf16.mxu1 %v2494_v16  ;;  %v2506_v30 = vld [vmem:[#allocation2 + $0x64] ss:$8 sps:$4 sm:$0xff]   ;;  %v2508_v31 = vld [vmem:[#allocation2 + $0x60] ss:$8 sps:$4 sm:$0xff]   ;;  %v2515_v36 = vld [vmem:[#allocation2 + $0x94] ss:$8 sps:$4 sm:$0xff]  }
  0x31   :  { %v2512_v34 = vld [vmem:[#allocation2 + $0x84] ss:$8 sps:$4 sm:$0xff]   ;;  %v2514_v35 = vld [vmem:[#allocation2 + $0x80] ss:$8 sps:$4 sm:$0xff]   ;;  %v2517_v37 = vld [vmem:[#allocation2 + $0x90] ss:$8 sps:$4 sm:$0xff]  }
  0x32   :  { %v2518_v38 = vld [vmem:[#allocation2 + $0xa4] ss:$8 sps:$4 sm:$0xff]   ;;  %v2520_v39 = vld [vmem:[#allocation2 + $0xa0] ss:$8 sps:$4 sm:$0xff]   ;;  %v2521_v40 = vld [vmem:[#allocation2 + $0xb4] ss:$8 sps:$4 sm:$0xff]  }
  0x33   :  { %184 = vmatpush1.bf16.msra.mxu0 %v2474_v8  ;;  %872 = vmatpush1.bf16.msra.mxu1 %v2496_v18  ;;  %v2523_v41 = vld [vmem:[#allocation2 + $0xb0] ss:$8 sps:$4 sm:$0xff]   ;;  %v2524_v42 = vld [vmem:[#allocation2 + $0xc4] ss:$8 sps:$4 sm:$0xff]   ;;  %v2526_v43 = vld [vmem:[#allocation2 + $0xc0] ss:$8 sps:$4 sm:$0xff]  }
  0x34   :  { %185 = vmatprep.subr.bf16.mxu0 %v2475_v9  ;;  %873 = vmatprep.subr.bf16.mxu1 %v2497_v20  ;;  %v2527_v44 = vld [vmem:[#allocation2 + $0xd4] ss:$8 sps:$4 sm:$0xff]   ;;  %v2529_v45 = vld [vmem:[#allocation2 + $0xd0] ss:$8 sps:$4 sm:$0xff]   ;;  %v2530_v46 = vld [vmem:[#allocation2 + $0xe4] ss:$8 sps:$4 sm:$0xff]  }
  0x35   :  { %v2532_v47 = vld [vmem:[#allocation2 + $0xe0] ss:$8 sps:$4 sm:$0xff]   ;;  %v2533_v48 = vld [vmem:[#allocation2 + $0xf4] ss:$8 sps:$4 sm:$0xff]   ;;  %v2535_v49 = vld [vmem:[#allocation2 + $0xf0] ss:$8 sps:$4 sm:$0xff]  }
  0x36   :  { %v2538_v50 = vld [vmem:[#allocation2 + $0x104] ss:$8 sps:$4 sm:$0xff]   ;;  %v2968_v53 = vsub.s32 0, %v2965_v52  ;;  %v79_v54 = vld [vmem:[%s3445_s2] sm:$0x3]  ;;  %v2974_v55 = vsub.s32 1, %v2965_v52 }
  0x37   :  { %186 = vmatpush1.bf16.msra.mxu0 %v2477_v13  ;;  %874 = vmatpush1.bf16.msra.mxu1 %v2499_v22  ;;  %v2977_v56 = vadd.s32 8, %v2965_v52  ;;  %v227_v59 = vand.u32 7, %v2965_v52  ;;  %vm272_vm0 = vcmp.lt.s32.totalorder %v2965_v52, 7  ;;  %vm255_vm1 = vcmp.lt.s32.totalorder %v2965_v52, 1  ;;  %v2583_v4 = vld [vmem:[#allocation2 + $0x1f4] ss:$8 sps:$4 sm:$0xff]  }
  0x38   :  { %187 = vmatprep.subr.bf16.mxu0 %v2478_v15  ;;  %875 = vmatprep.subr.bf16.mxu1 %v2500_v24  ;;  %v84_v57 = vrot.slane %v79_v54, %v2968_v53  ;;  %v88_v58 = vrot.slane %v79_v54, %v2974_v55  ;;  %v2571_v54 = vld [vmem:[#allocation2 + $0x1b4] ss:$8 sps:$4 sm:$0xff]   ;;  %s2833_s2 = smov 16   ;;  %s2835_s26 = smov 64  }
  0x39   :  { %v234_v61 = vand.u32 7, %v2977_v56  ;;  %vm2991_vm2 = vcmp.ne.s32.totalorder %v227_v59, 0  ;;  %vm2437_vm6 = vcmp.ne.s32.totalorder %v227_v59, 7  ;;  %v2587_v56 = vld [vmem:[#allocation2 + $0x210] ss:$8 sps:$4 sm:$0xff]  }
  0x3a   :  { %v2592_v59 = vld [vmem:[#allocation2 + $0x224] ss:$8 sps:$4 sm:$0xff]   ;;  %v2691_v24 = vld [vmem:[#allocation4 + $0x134] ss:$8 sps:$4 sm:$0xff]  }
  0x3b   :  { %188 = vmatpush1.bf16.msra.mxu0 %v2480_v17  ;;  %876 = vmatpush1.bf16.msra.mxu1 %v2502_v26  ;;  %vm2999_vm3 = vcmp.ne.s32.totalorder %v234_v61, 0  ;;  %vm2436_vm5 = vcmp.ne.s32.totalorder %v234_v61, 7  ;;  %v2590_v61 = vld [vmem:[#allocation2 + $0x220] ss:$8 sps:$4 sm:$0xff]  }
  0x3c   :  { %189 = vmatprep.subr.bf16.mxu0 %v2481_v19  ;;  %877 = vmatprep.subr.bf16.mxu1 %v2503_v28  ;;  %vm3029_vm4 = vmpackc.low %vm2999_vm3, %vm2991_vm2 }
  0x3d   :  { %vm3051_vm7 = vmpackc.low %vm2436_vm5, %vm2437_vm6 }
  0x3f   :  { %190 = vmatpush1.bf16.msra.mxu0 %v2483_v21  ;;  %878 = vmatpush1.bf16.msra.mxu1 %v2505_v29 }
  0x40   :  { %191 = vmatprep.subr.bf16.mxu0 %v2484_v23  ;;  %879 = vmatprep.subr.bf16.mxu1 %v2506_v30  ;;  %v2541_v30 = vld [vmem:[#allocation2 + $0x114] ss:$8 sps:$4 sm:$0xff]  }
  0x43   :  { %192 = vmatpush1.bf16.msra.mxu0 %v2486_v25  ;;  %880 = vmatpush1.bf16.msra.mxu1 %v2508_v31 }
  0x44   :  { %881 = vmatprep.subr.bf16.mxu1 %v2509_v32  ;;  %v2539_v32 = vld [vmem:[#allocation2 + $0x110] ss:$8 sps:$4 sm:$0xff]  }
  0x46   :  { %210 = vmatmul.mubr.bf16.vlgmr.msra.gmra.mrb[0].mxu0 %v2487_v27  ;;  %v2536_v27 = vld [vmem:[#allocation2 + $0x100] ss:$8 sps:$4 sm:$0xff]  }
  0x47   :  { %882 = vmatpush1.bf16.msra.mxu1 %v2511_v33  ;;  %v2544_v33 = vld [vmem:[#allocation2 + $0x124] ss:$8 sps:$4 sm:$0xff]  }
  0x48   :  { %883 = vmatprep.subr.bf16.mxu1 %v2512_v34  ;;  %v2542_v34 = vld [vmem:[#allocation2 + $0x120] ss:$8 sps:$4 sm:$0xff]  }
  0x4b   :  { %884 = vmatpush1.bf16.msra.mxu1 %v2514_v35  ;;  %v2547_v35 = vld [vmem:[#allocation2 + $0x134] ss:$8 sps:$4 sm:$0xff]  }
  0x4c   :  { %885 = vmatprep.subr.bf16.mxu1 %v2515_v36  ;;  %v2545_v36 = vld [vmem:[#allocation2 + $0x130] ss:$8 sps:$4 sm:$0xff]  }
  0x4f   :  { %886 = vmatpush1.bf16.msra.mxu1 %v2517_v37  ;;  %v2550_v37 = vld [vmem:[#allocation2 + $0x144] ss:$8 sps:$4 sm:$0xff]  }
  0x50   :  { %887 = vmatprep.subr.bf16.mxu1 %v2518_v38  ;;  %v2548_v38 = vld [vmem:[#allocation2 + $0x140] ss:$8 sps:$4 sm:$0xff]  }
  0x53   :  { %888 = vmatpush1.bf16.msra.mxu1 %v2520_v39  ;;  %v2553_v39 = vld [vmem:[#allocation2 + $0x154] ss:$8 sps:$4 sm:$0xff]  }
  0x54   :  { %889 = vmatprep.subr.bf16.mxu1 %v2521_v40  ;;  %v2551_v40 = vld [vmem:[#allocation2 + $0x150] ss:$8 sps:$4 sm:$0xff]  }
  0x57   :  { %890 = vmatpush1.bf16.msra.mxu1 %v2523_v41  ;;  %v2556_v41 = vld [vmem:[#allocation2 + $0x164] ss:$8 sps:$4 sm:$0xff]  }
  0x58   :  { %891 = vmatprep.subr.bf16.mxu1 %v2524_v42  ;;  %v2554_v42 = vld [vmem:[#allocation2 + $0x160] ss:$8 sps:$4 sm:$0xff]  }
  0x5b   :  { %892 = vmatpush1.bf16.msra.mxu1 %v2526_v43  ;;  %v2559_v43 = vld [vmem:[#allocation2 + $0x174] ss:$8 sps:$4 sm:$0xff]  }
  0x5c   :  { %893 = vmatprep.subr.bf16.mxu1 %v2527_v44  ;;  %v2557_v44 = vld [vmem:[#allocation2 + $0x170] ss:$8 sps:$4 sm:$0xff]  }
  0x5f   :  { %894 = vmatpush1.bf16.msra.mxu1 %v2529_v45  ;;  %v2562_v45 = vld [vmem:[#allocation2 + $0x184] ss:$8 sps:$4 sm:$0xff]  }
  0x60   :  { %895 = vmatprep.subr.bf16.mxu1 %v2530_v46  ;;  %v2560_v46 = vld [vmem:[#allocation2 + $0x180] ss:$8 sps:$4 sm:$0xff]  }
  0x63   :  { %896 = vmatpush1.bf16.msra.mxu1 %v2532_v47  ;;  %v2565_v47 = vld [vmem:[#allocation2 + $0x194] ss:$8 sps:$4 sm:$0xff]  }
  0x64   :  { %897 = vmatprep.subr.bf16.mxu1 %v2533_v48  ;;  %v2563_v48 = vld [vmem:[#allocation2 + $0x190] ss:$8 sps:$4 sm:$0xff]  }
  0x67   :  { %898 = vmatpush1.bf16.msra.mxu1 %v2535_v49  ;;  %v2568_v49 = vld [vmem:[#allocation2 + $0x1a4] ss:$8 sps:$4 sm:$0xff]  }
  0x68   :  { %910 = vmatprep.subr.bf16.mxu1 %v2538_v50  ;;  %v2566_v50 = vld [vmem:[#allocation2 + $0x1a0] ss:$8 sps:$4 sm:$0xff]  }
 0x119   :  { %v211_v60 = vpop.f32.mrb[0].mxu0 }
 0x11a   :  { %v2983_v62 = vadd.f32 %v211_v60, %v84_v57  ;;  %v213_v63 = vpop.f32.mrb[1].mxu0  ;;  %v2572_v60 = vld [vmem:[#allocation2 + $0x1c0] ss:$8 sps:$4 sm:$0xff]  }
 0x11b   :  { %v214_v0 = vadd.f32 %v213_v63, %v88_v58  ;;  %v215_v1 = vpop.f32.mrb[2].mxu0  ;;  %v2577_v63 = vld [vmem:[#allocation2 + $0x1d4] ss:$8 sps:$4 sm:$0xff]  }
 0x11c   :  { %v2985_v2 = vadd.f32 %v215_v1, %v84_v57  ;;  %v217_v3 = vpop.f32.mrb[3].mxu0  ;;  %v251_v5 = vrot.slane %v2983_v62, 7  ;;  %v268_v6 = vrot.slane %v2983_v62, 1  ;;  %v2569_v57 = vld [vmem:[#allocation2 + $0x1b0] ss:$8 sps:$4 sm:$0xff]  }
 0x11d   :  { %v218_v7 = vadd.f32 %v217_v3, %v88_v58  ;;  %v252_v9 = vrot.slane %v214_v0, 7  ;;  %v269_v13 = vrot.slane %v214_v0, 1  ;;  %v2574_v58 = vld [vmem:[#allocation2 + $0x1c4] ss:$8 sps:$4 sm:$0xff]   ;;  %v2578_v3 = vld [vmem:[#allocation2 + $0x1e0] ss:$8 sps:$4 sm:$0xff]  }
 0x11e   :  { %v253_v10 = vrot.slane %v2985_v2, 7  ;;  %v270_v11 = vrot.slane %v2985_v2, 1  ;;  %v287_v12 = vpack.c.bf16 %v2985_v2, %v2983_v62  ;;  %v2580_v1 = vld [vmem:[#allocation2 + $0x1e4] ss:$8 sps:$4 sm:$0xff]   ;;  %v2596_v62 = vld [vmem:[#allocation2 + $0x240] ss:$8 sps:$4 sm:$0xff]  }
 0x11f   :  { %v254_v14 = vrot.slane %v218_v7, 7  ;;  %v271_v15 = vrot.slane %v218_v7, 1  ;;  %v288_v16 = vpack.c.bf16 %v218_v7, %v214_v0  ;;  %v2575_v0 = vld [vmem:[#allocation2 + $0x1d0] ss:$8 sps:$4 sm:$0xff]   ;;  %v2584_v7 = vld [vmem:[#allocation2 + $0x200] ss:$8 sps:$4 sm:$0xff]  }
 0x120   :  { %v3009_v17 = vsel %vm272_vm0, %v268_v6, %v270_v11  ;;  %v3013_v18 = vsel %vm272_vm0, %v270_v11, %v268_v6  ;;  %v256_v19 = vsel %vm255_vm1, %v251_v5, %v253_v10  ;;  %v258_v20 = vsel %vm255_vm1, %v253_v10, %v251_v5  ;;  %v2581_v5 = vld [vmem:[#allocation2 + $0x1f0] ss:$8 sps:$4 sm:$0xff]   ;;  %v2586_v6 = vld [vmem:[#allocation2 + $0x204] ss:$8 sps:$4 sm:$0xff]   ;;  %v2595_v10 = vld [vmem:[#allocation2 + $0x234] ss:$8 sps:$4 sm:$0xff]  }
 0x121   :  { %v2312_v21 = vpack.c.bf16 %v3013_v18, %v3009_v17  ;;  %v257_v22 = vsel %vm255_vm1, %v252_v9, %v254_v14  ;;  %v259_v23 = vsel %vm255_vm1, %v254_v14, %v252_v9  ;;  %v2302_v25 = vpack.c.bf16 %v256_v19, %v258_v20  ;;  %v2589_v9 = vld [vmem:[#allocation2 + $0x214] ss:$8 sps:$4 sm:$0xff]   ;;  %v2593_v11 = vld [vmem:[#allocation2 + $0x230] ss:$8 sps:$4 sm:$0xff]   ;;  %v2604_v14 = vld [vmem:[#allocation2 + $0x264] ss:$8 sps:$4 sm:$0xff]  }
 0x122   :  { %v2297_v26 = vpack.c.bf16 %v257_v22, %v259_v23  ;;  %v3035_v28 = vsel %vm272_vm0, %v269_v13, %v271_v15  ;;  %v3039_v29 = vsel %vm272_vm0, %v271_v15, %v269_v13  ;;  %v2598_v13 = vld [vmem:[#allocation2 + $0x244] ss:$8 sps:$4 sm:$0xff]   ;;  %v2601_v2 = vld [vmem:[#allocation2 + $0x254] ss:$8 sps:$4 sm:$0xff]   ;;  %v2602_v15 = vld [vmem:[#allocation2 + $0x260] ss:$8 sps:$4 sm:$0xff]  }
 0x123   :  { %v2307_v31 = vpack.c.bf16 %v3039_v29, %v3035_v28  ;;  %v2605_v19 = vld [vmem:[#allocation2 + $0x270] ss:$8 sps:$4 sm:$0xff]   ;;  %v2610_v20 = vld [vmem:[#allocation2 + $0x284] ss:$8 sps:$4 sm:$0xff]   ;;  %v2608_v22 = vld [vmem:[#allocation2 + $0x280] ss:$8 sps:$4 sm:$0xff]  }
 0x124   :  { %2298 = vmatprep.mubr.msk.bf16.mxu1 %vm3029_vm4, %v2297_v26  ;;  %v2613_v23 = vld [vmem:[#allocation2 + $0x294] ss:$8 sps:$4 sm:$0xff]   ;;  %v2616_v26 = vld [vmem:[#allocation2 + $0x2a4] ss:$8 sps:$4 sm:$0xff]   ;;  %v2617_v29 = vld [vmem:[#allocation2 + $0x2b0] ss:$8 sps:$4 sm:$0xff]  }
 0x125   :  { %2303 = vmatmul.mubr.msk.bf16.vlgmr.msra.gmra.mrb[0].mxu1 %vm3029_vm4, %v2302_v25  ;;  %v2611_v25 = vld [vmem:[#allocation2 + $0x290] ss:$8 sps:$4 sm:$0xff]   ;;  %v2619_v28 = vld [vmem:[#allocation2 + $0x2b4] ss:$8 sps:$4 sm:$0xff]   ;;  %v3085_v17 = vand.u32 127, %v81_v51 }
 0x126   :  { %911 = vmatpush1.bf16.msra.mxu1 %v2536_v27  ;;  %942 = vmatprep.mubr.bf16.mxu1 %v288_v16  ;;  %v2607_v16 = vld [vmem:[#allocation2 + $0x274] ss:$8 sps:$4 sm:$0xff]   ;;  %v2614_v27 = vld [vmem:[#allocation2 + $0x2a0] ss:$8 sps:$4 sm:$0xff]  }
 0x127   :  { %912 = vmatprep.subr.bf16.mxu1 %v2541_v30  ;;  %v2622_v30 = vld [vmem:[#allocation2 + $0x2c4] ss:$8 sps:$4 sm:$0xff]   ;;  %vm1006_vm8 = vcmp.lt.s32.totalorder %v3085_v17, 8  ;;  %vm1023_vm9 = vcmp.lt.s32.totalorder %v3085_v17, 16  ;;  %vm1040_vm10 = vcmp.lt.s32.totalorder %v3085_v17, 32  ;;  %vm1057_vm11 = vcmp.lt.s32.totalorder %v3085_v17, 64 }
 0x12a   :  { %913 = vmatpush1.bf16.msra.mxu1 %v2539_v32  ;;  %v2625_v32 = vld [vmem:[#allocation2 + $0x2d4] ss:$8 sps:$4 sm:$0xff]  }
 0x12b   :  { %914 = vmatprep.subr.bf16.mxu1 %v2544_v33  ;;  %v2623_v33 = vld [vmem:[#allocation2 + $0x2d0] ss:$8 sps:$4 sm:$0xff]  }
 0x12e   :  { %915 = vmatpush1.bf16.msra.mxu1 %v2542_v34  ;;  %v2628_v34 = vld [vmem:[#allocation2 + $0x2e4] ss:$8 sps:$4 sm:$0xff]  }
 0x12f   :  { %916 = vmatprep.subr.bf16.mxu1 %v2547_v35  ;;  %v2626_v35 = vld [vmem:[#allocation2 + $0x2e0] ss:$8 sps:$4 sm:$0xff]  }
 0x132   :  { %917 = vmatpush1.bf16.msra.mxu1 %v2545_v36  ;;  %v2631_v36 = vld [vmem:[#allocation2 + $0x2f4] ss:$8 sps:$4 sm:$0xff]  }
 0x133   :  { %918 = vmatprep.subr.bf16.mxu1 %v2550_v37  ;;  %v2629_v37 = vld [vmem:[#allocation2 + $0x2f0] ss:$8 sps:$4 sm:$0xff]  }
 0x136   :  { %919 = vmatpush1.bf16.msra.mxu1 %v2548_v38 }
 0x137   :  { %920 = vmatprep.subr.bf16.mxu1 %v2553_v39 }
 0x13a   :  { %921 = vmatpush1.bf16.msra.mxu1 %v2551_v40 }
 0x13b   :  { %922 = vmatprep.subr.bf16.mxu1 %v2556_v41 }
 0x13e   :  { %923 = vmatpush1.bf16.msra.mxu1 %v2554_v42 }
 0x13f   :  { %924 = vmatprep.subr.bf16.mxu1 %v2559_v43 }
 0x142   :  { %925 = vmatpush1.bf16.msra.mxu1 %v2557_v44 }
 0x143   :  { %926 = vmatprep.subr.bf16.mxu1 %v2562_v45 }
 0x146   :  { %927 = vmatpush1.bf16.msra.mxu1 %v2560_v46 }
 0x147   :  { %928 = vmatprep.subr.bf16.mxu1 %v2565_v47 }
 0x14a   :  { %929 = vmatpush1.bf16.msra.mxu1 %v2563_v48 }
 0x14b   :  { %930 = vmatprep.subr.bf16.mxu1 %v2568_v49 }
 0x14e   :  { %931 = vmatpush1.bf16.msra.mxu1 %v2566_v50 }
 0x14f   :  { %932 = vmatprep.subr.bf16.mxu1 %v2571_v54 }
 0x152   :  { %933 = vmatpush1.bf16.msra.mxu1 %v2569_v57 }
 0x153   :  { %934 = vmatprep.subr.bf16.mxu1 %v2574_v58 }
 0x156   :  { %935 = vmatpush1.bf16.msra.mxu1 %v2572_v60 }
 0x157   :  { %936 = vmatprep.subr.bf16.mxu1 %v2577_v63 }
 0x15a   :  { %937 = vmatpush1.bf16.msra.mxu1 %v2575_v0 }
 0x15b   :  { %938 = vmatprep.subr.bf16.mxu1 %v2580_v1 }
 0x15e   :  { %939 = vmatpush1.bf16.msra.mxu1 %v2578_v3 }
 0x15f   :  { %940 = vmatprep.subr.bf16.mxu1 %v2583_v4 }
 0x162   :  { %941 = vmatpush1.bf16.msra.mxu1 %v2581_v5 }
 0x163   :  { %953 = vmatprep.subr.bf16.mxu1 %v2586_v6 }
 0x165   :  { %943 = vmatmul.mubr.bf16.vlgmr.msra.gmra.mrb[0].mxu1 %v287_v12  ;;  %v2599_v12 = vld [vmem:[#allocation2 + $0x250] ss:$8 sps:$4 sm:$0xff]  }
 0x166   :  { %954 = vmatpush1.bf16.msra.mxu1 %v2584_v7  ;;  %2308 = vmatprep.mubr.msk.bf16.mxu1 %vm3051_vm7, %v2307_v31  ;;  %v2620_v31 = vld [vmem:[#allocation2 + $0x2c0] ss:$8 sps:$4 sm:$0xff]  }
 0x167   :  { %955 = vmatprep.subr.bf16.mxu1 %v2589_v9 }
 0x16a   :  { %956 = vmatpush1.bf16.msra.mxu1 %v2587_v56 }
 0x16b   :  { %957 = vmatprep.subr.bf16.mxu1 %v2592_v59 }
 0x16e   :  { %958 = vmatpush1.bf16.msra.mxu1 %v2590_v61 }
 0x16f   :  { %959 = vmatprep.subr.bf16.mxu1 %v2595_v10 }
 0x172   :  { %960 = vmatpush1.bf16.msra.mxu1 %v2593_v11 }
 0x173   :  { %961 = vmatprep.subr.bf16.mxu1 %v2598_v13 }
 0x176   :  { %962 = vmatpush1.bf16.msra.mxu1 %v2596_v62 }
 0x177   :  { %963 = vmatprep.subr.bf16.mxu1 %v2601_v2 }
 0x17a   :  { %964 = vmatpush1.bf16.msra.mxu1 %v2599_v12 }
 0x17b   :  { %965 = vmatprep.subr.bf16.mxu1 %v2604_v14 }
 0x17e   :  { %966 = vmatpush1.bf16.msra.mxu1 %v2602_v15 }
 0x17f   :  { %967 = vmatprep.subr.bf16.mxu1 %v2607_v16 }
 0x182   :  { %968 = vmatpush1.bf16.msra.mxu1 %v2605_v19 }
 0x183   :  { %969 = vmatprep.subr.bf16.mxu1 %v2610_v20 }
 0x186   :  { %970 = vmatpush1.bf16.msra.mxu1 %v2608_v22 }
 0x187   :  { %971 = vmatprep.subr.bf16.mxu1 %v2613_v23 }
 0x18a   :  { %972 = vmatpush1.bf16.msra.mxu1 %v2611_v25 }
 0x18b   :  { %973 = vmatprep.subr.bf16.mxu1 %v2616_v26 }
 0x18e   :  { %974 = vmatpush1.bf16.msra.mxu1 %v2614_v27 }
 0x18f   :  { %975 = vmatprep.subr.bf16.mxu1 %v2619_v28 }
 0x192   :  { %976 = vmatpush1.bf16.msra.mxu1 %v2617_v29 }
 0x193   :  { %977 = vmatprep.subr.bf16.mxu1 %v2622_v30 }
 0x196   :  { %978 = vmatpush1.bf16.msra.mxu1 %v2620_v31 }
 0x197   :  { %979 = vmatprep.subr.bf16.mxu1 %v2625_v32 }
 0x19a   :  { %980 = vmatpush1.bf16.msra.mxu1 %v2623_v33 }
 0x19b   :  { %981 = vmatprep.subr.bf16.mxu1 %v2628_v34 }
 0x19e   :  { %982 = vmatpush1.bf16.msra.mxu1 %v2626_v35 }
 0x19f   :  { %983 = vmatprep.subr.bf16.mxu1 %v2631_v36 }
 0x1a2   :  { %984 = vmatpush1.bf16.msra.mxu1 %v2629_v37 }
 0x1a5   :  { %2313 = vmatmul.mubr.msk.bf16.vlgmr.msra.gmra.mrb[0].mxu1 %vm3051_vm7, %v2312_v21 }
 0x278   :  { %v3068_v38 = vpop.f32.mrb[0].mxu1 }
 0x279   :  { %996 = vrot.lane.b32.xlu0 %v3068_v38, %s2830_s20  ;;  %v3072_v39 = vpop.f32.mrb[1].mxu1 }
 0x27a   :  { %1000 = vrot.lane.b32.xlu1 %v3072_v39, %s2830_s20  ;;  %v3076_v40 = vpop.f32.mrb[2].mxu1 }
 0x27b   :  { %v3078_v41 = vpop.f32.mrb[3].mxu1 }
 0x27d   :  { %998 = vrot.lane.b32.xlu0 %v3076_v40, %s2830_s20 }
 0x27e   :  { %1002 = vrot.lane.b32.xlu1 %v3078_v41, %s2830_s20 }
 0x2eb   :  { %v997_v18 = vpop.permute.xlu0 %996 }
 0x2ec   :  { %v1001_v21 = vpop.permute.xlu1 %1000 }
 0x2ed   :  { %v1009_v42 = vsel %vm1006_vm8, %v1001_v21, %v997_v18  ;;  %v1007_v44 = vsel %vm1006_vm8, %v997_v18, %v1001_v21 }
 0x2ee   :  { %v1011_v43 = vadd.f32 %v1009_v42, %v3068_v38  ;;  %v1012_v47 = vadd.f32 %v1007_v44, %v3072_v39 }
 0x2ef   :  { %v999_v45 = vpop.permute.xlu0 %998 }
 0x2f0   :  { %1015 = vrot.lane.b32.xlu0 %v1011_v43, %s2833_s2  ;;  %v1003_v46 = vpop.permute.xlu1 %1002 }
 0x2f1   :  { %v1010_v51 = vsel %vm1006_vm8, %v1003_v46, %v999_v45  ;;  %v1008_v49 = vsel %vm1006_vm8, %v999_v45, %v1003_v46 }
 0x2f2   :  { %v1013_v48 = vadd.f32 %v1010_v51, %v3076_v40  ;;  %v1014_v50 = vadd.f32 %v1008_v49, %v3078_v41 }
 0x2f4   :  { %1019 = vrot.lane.b32.xlu0 %v1012_v47, %s2833_s2  ;;  %1017 = vrot.lane.b32.xlu1 %v1013_v48, %s2833_s2 }
 0x2f8   :  { %1021 = vrot.lane.b32.xlu1 %v1014_v50, %s2833_s2 }
 0x362   :  { %v1016_v54 = vpop.permute.xlu0 %1015 }
 0x366   :  { %v1020_v57 = vpop.permute.xlu0 %1019  ;;  %v1018_v58 = vpop.permute.xlu1 %1017 }
 0x367   :  { %v1026_v60 = vsel %vm1023_vm9, %v1020_v57, %v1016_v54  ;;  %v1024_v0 = vsel %vm1023_vm9, %v1016_v54, %v1020_v57 }
 0x368   :  { %v1028_v63 = vadd.f32 %v1026_v60, %v1011_v43  ;;  %v1029_v4 = vadd.f32 %v1024_v0, %v1012_v47 }
 0x36a   :  { %1032 = vrot.lane.b32.xlu0 %v1028_v63, %s2834_s25  ;;  %v1022_v1 = vpop.permute.xlu1 %1021 }
 0x36b   :  { %v1027_v3 = vsel %vm1023_vm9, %v1022_v1, %v1018_v58  ;;  %v1025_v6 = vsel %vm1023_vm9, %v1018_v58, %v1022_v1 }
 0x36c   :  { %v1030_v5 = vadd.f32 %v1027_v3, %v1013_v48  ;;  %v1031_v7 = vadd.f32 %v1025_v6, %v1014_v50 }
 0x36e   :  { %1036 = vrot.lane.b32.xlu0 %v1029_v4, %s2834_s25  ;;  %1034 = vrot.lane.b32.xlu1 %v1030_v5, %s2834_s25 }
 0x372   :  { %1038 = vrot.lane.b32.xlu1 %v1031_v7, %s2834_s25 }
 0x3dc   :  { %v1033_v9 = vpop.permute.xlu0 %1032 }
 0x3e0   :  { %v1037_v56 = vpop.permute.xlu0 %1036  ;;  %v1035_v59 = vpop.permute.xlu1 %1034 }
 0x3e1   :  { %v1043_v61 = vsel %vm1040_vm10, %v1037_v56, %v1033_v9  ;;  %v1041_v11 = vsel %vm1040_vm10, %v1033_v9, %v1037_v56 }
 0x3e2   :  { %v1045_v10 = vadd.f32 %v1043_v61, %v1028_v63  ;;  %v1046_v2 = vadd.f32 %v1041_v11, %v1029_v4  ;;  %v2634_v11 = vld [vmem:[#allocation4 + $0x4] ss:$8 sps:$4 sm:$0xff]  }
 0x3e3   :  { %1820 = vmatprep.subr.bf16.mxu0 %v2634_v11 }
 0x3e4   :  { %1049 = vrot.lane.b32.xlu0 %v1045_v10, %s2835_s26  ;;  %v1039_v13 = vpop.permute.xlu1 %1038 }
 0x3e5   :  { %v1044_v62 = vsel %vm1040_vm10, %v1039_v13, %v1035_v59  ;;  %v1042_v14 = vsel %vm1040_vm10, %v1035_v59, %v1039_v13 }
 0x3e6   :  { %v1047_v12 = vadd.f32 %v1044_v62, %v1030_v5  ;;  %v1048_v15 = vadd.f32 %v1042_v14, %v1031_v7 }
 0x3e8   :  { %1053 = vrot.lane.b32.xlu0 %v1046_v2, %s2835_s26  ;;  %1051 = vrot.lane.b32.xlu1 %v1047_v12, %s2835_s26 }
 0x3ec   :  { %1055 = vrot.lane.b32.xlu1 %v1048_v15, %s2835_s26 }
 0x456   :  { %v1050_v16 = vpop.permute.xlu0 %1049 }
 0x45a   :  { %v1054_v19 = vpop.permute.xlu0 %1053  ;;  %v1052_v20 = vpop.permute.xlu1 %1051 }
 0x45b   :  { %v1058_v22 = vsel %vm1057_vm11, %v1050_v16, %v1054_v19  ;;  %v1060_v23 = vsel %vm1057_vm11, %v1054_v19, %v1050_v16  ;;  %v2638_v16 = vld [vmem:[#allocation4 + $0x20] ss:$8 sps:$4 sm:$0xff]   ;;  %v2640_v19 = vld [vmem:[#allocation4 + $0x24] ss:$8 sps:$4 sm:$0xff]  }
 0x45c   :  { %v1062_v25 = vadd.f32 %v1060_v23, %v1045_v10  ;;  %v1063_v26 = vadd.f32 %v1058_v22, %v1046_v2  ;;  %v2632_v10 = vld [vmem:[#allocation4] ss:$8 sps:$4 sm:$0xff]   ;;  %v2637_v2 = vld [vmem:[#allocation4 + $0x14] ss:$8 sps:$4 sm:$0xff]  }
 0x45d   :  { %1821 = vmatpush1.bf16.msra.mxu0 %v2632_v10  ;;  %v2643_v23 = vld [vmem:[#allocation4 + $0x34] ss:$8 sps:$4 sm:$0xff]  }
 0x45e   :  { %v1056_v27 = vpop.permute.xlu1 %1055  ;;  %v1066_v32 = vadd.f32 %v1063_v26, %v1062_v25  ;;  %1822 = vmatprep.subr.bf16.mxu0 %v2637_v2  ;;  %v2641_v25 = vld [vmem:[#allocation4 + $0x30] ss:$8 sps:$4 sm:$0xff]  }
 0x45f   :  { %v1059_v28 = vsel %vm1057_vm11, %v1052_v20, %v1056_v27  ;;  %v1061_v29 = vsel %vm1057_vm11, %v1056_v27, %v1052_v20 }
 0x460   :  { %v1064_v30 = vadd.f32 %v1061_v29, %v1047_v12  ;;  %v1065_v31 = vadd.f32 %v1059_v28, %v1048_v15  ;;  %v2635_v15 = vld [vmem:[#allocation4 + $0x10] ss:$8 sps:$4 sm:$0xff]   ;;  %v2646_v28 = vld [vmem:[#allocation4 + $0x44] ss:$8 sps:$4 sm:$0xff]  }
 0x461   :  { %1823 = vmatpush1.bf16.msra.mxu0 %v2635_v15 }
 0x462   :  { %v1067_v33 = vadd.f32 %v1065_v31, %v1064_v30  ;;  %1824 = vmatprep.subr.bf16.mxu0 %v2640_v19  ;;  %v2644_v31 = vld [vmem:[#allocation4 + $0x40] ss:$8 sps:$4 sm:$0xff]  }
 0x464   :  { %v1068_v34 = vadd.f32 %v1067_v33, %v1066_v32 }
 0x465   :  { %1825 = vmatpush1.bf16.msra.mxu0 %v2638_v16 }
 0x466   :  { %v1069_v35 = vrot.slane %v1068_v34, 4  ;;  %1826 = vmatprep.subr.bf16.mxu0 %v2643_v23 }
 0x468   :  { %v1070_v36 = vadd.f32 %v1069_v35, %v1068_v34 }
 0x469   :  { %1827 = vmatpush1.bf16.msra.mxu0 %v2641_v25 }
 0x46a   :  { %v1071_v37 = vrot.slane %v1070_v36, 2  ;;  %1828 = vmatprep.subr.bf16.mxu0 %v2646_v28 }
 0x46c   :  { %v1072_v18 = vadd.f32 %v1071_v37, %v1070_v36  ;;  %v2649_v36 = vld [vmem:[#allocation4 + $0x54] ss:$8 sps:$4 sm:$0xff]   ;;  %v2647_v37 = vld [vmem:[#allocation4 + $0x50] ss:$8 sps:$4 sm:$0xff]  }
 0x46d   :  { %1829 = vmatpush1.bf16.msra.mxu0 %v2644_v31 }
 0x46e   :  { %v1073_v21 = vrot.slane %v1072_v18, 1  ;;  %1830 = vmatprep.subr.bf16.mxu0 %v2649_v36 }
 0x470   :  { %v1074_v42 = vadd.f32 %v1073_v21, %v1072_v18 }
 0x471   :  { %1831 = vmatpush1.bf16.msra.mxu0 %v2647_v37  ;;  %v1158_v37 = vld [vmem:[%s3447_s4] sm:$0x3] }
 0x472   :  { %v1075_v43 = vmul.f32 0.001953125, %v1074_v42  ;;  %v2652_v42 = vld [vmem:[#allocation4 + $0x64] ss:$8 sps:$4 sm:$0xff]  }
 0x473   :  { %1832 = vmatprep.subr.bf16.mxu0 %v2652_v42 }
 0x474   :  { %v3140_v44 = vsub.f32 %v3076_v40, %v1075_v43  ;;  %v3143_v45 = vsub.f32 %v3068_v38, %v1075_v43  ;;  %v3150_v47 = vsub.f32 %v3078_v41, %v1075_v43  ;;  %v3153_v48 = vsub.f32 %v3072_v39, %v1075_v43  ;;  %v2650_v43 = vld [vmem:[#allocation4 + $0x60] ss:$8 sps:$4 sm:$0xff]  }
 0x475   :  { %1833 = vmatpush1.bf16.msra.mxu0 %v2650_v43 }
 0x476   :  { %v1082_v46 = vmul.f32 %v3140_v44, %v3140_v44  ;;  %v1080_v51 = vmul.f32 %v3143_v45, %v3143_v45  ;;  %v1083_v38 = vmul.f32 %v3150_v47, %v3150_v47  ;;  %v1081_v40 = vmul.f32 %v3153_v48, %v3153_v48 }
 0x478   :  { %1086 = vrot.lane.b32.xlu1 %v1082_v46, %s2830_s20  ;;  %1084 = vrot.lane.b32.xlu0 %v1080_v51, %s2830_s20 }
 0x47c   :  { %1090 = vrot.lane.b32.xlu1 %v1083_v38, %s2830_s20  ;;  %1088 = vrot.lane.b32.xlu0 %v1081_v40, %s2830_s20 }
 0x4ea   :  { %v1087_v49 = vpop.permute.xlu1 %1086  ;;  %v1085_v41 = vpop.permute.xlu0 %1084 }
 0x4ee   :  { %v1091_v50 = vpop.permute.xlu1 %1090  ;;  %v1089_v54 = vpop.permute.xlu0 %1088 }
 0x4ef   :  { %v1095_v39 = vsel %vm1006_vm8, %v1091_v50, %v1087_v49  ;;  %v1094_v57 = vsel %vm1006_vm8, %v1089_v54, %v1085_v41  ;;  %v1093_v63 = vsel %vm1006_vm8, %v1087_v49, %v1091_v50  ;;  %v1092_v0 = vsel %vm1006_vm8, %v1085_v41, %v1089_v54  ;;  %v2661_v49 = vld [vmem:[#allocation4 + $0x94] ss:$8 sps:$4 sm:$0xff]   ;;  %v2659_v41 = vld [vmem:[#allocation4 + $0x90] ss:$8 sps:$4 sm:$0xff]   ;;  %v2664_v50 = vld [vmem:[#allocation4 + $0xa4] ss:$8 sps:$4 sm:$0xff]  }
 0x4f0   :  { %v1098_v58 = vadd.f32 %v1095_v39, %v1082_v46  ;;  %v1096_v60 = vadd.f32 %v1094_v57, %v1080_v51  ;;  %v1099_v1 = vadd.f32 %v1093_v63, %v1083_v38  ;;  %v1097_v3 = vadd.f32 %v1092_v0, %v1081_v40  ;;  %v2655_v46 = vld [vmem:[#allocation4 + $0x74] ss:$8 sps:$4 sm:$0xff]   ;;  %v2653_v51 = vld [vmem:[#allocation4 + $0x70] ss:$8 sps:$4 sm:$0xff]   ;;  %v2658_v38 = vld [vmem:[#allocation4 + $0x84] ss:$8 sps:$4 sm:$0xff]  }
 0x4f1   :  { %1834 = vmatprep.subr.bf16.mxu0 %v2655_v46  ;;  %v2656_v40 = vld [vmem:[#allocation4 + $0x80] ss:$8 sps:$4 sm:$0xff]   ;;  %v2667_v39 = vld [vmem:[#allocation4 + $0xb4] ss:$8 sps:$4 sm:$0xff]   ;;  %v2665_v57 = vld [vmem:[#allocation4 + $0xb0] ss:$8 sps:$4 sm:$0xff]  }
 0x4f2   :  { %1102 = vrot.lane.b32.xlu1 %v1098_v58, %s2833_s2  ;;  %1100 = vrot.lane.b32.xlu0 %v1096_v60, %s2833_s2  ;;  %v2662_v54 = vld [vmem:[#allocation4 + $0xa0] ss:$8 sps:$4 sm:$0xff]   ;;  %v2673_v63 = vld [vmem:[#allocation4 + $0xd4] ss:$8 sps:$4 sm:$0xff]   ;;  %v2671_v0 = vld [vmem:[#allocation4 + $0xd0] ss:$8 sps:$4 sm:$0xff]  }
 0x4f3   :  { %1835 = vmatpush1.bf16.msra.mxu0 %v2653_v51 }
 0x4f4   :  { %1836 = vmatprep.subr.bf16.mxu0 %v2658_v38 }
 0x4f6   :  { %1106 = vrot.lane.b32.xlu1 %v1099_v1, %s2833_s2  ;;  %1104 = vrot.lane.b32.xlu0 %v1097_v3, %s2833_s2 }
 0x4f7   :  { %1837 = vmatpush1.bf16.msra.mxu0 %v2656_v40 }
 0x4f8   :  { %1838 = vmatprep.subr.bf16.mxu0 %v2661_v49 }
 0x4fb   :  { %1839 = vmatpush1.bf16.msra.mxu0 %v2659_v41 }
 0x4fc   :  { %1840 = vmatprep.subr.bf16.mxu0 %v2664_v50 }
 0x4ff   :  { %1841 = vmatpush1.bf16.msra.mxu0 %v2662_v54 }
 0x500   :  { %1842 = vmatprep.subr.bf16.mxu0 %v2667_v39 }
 0x503   :  { %1843 = vmatpush1.bf16.msra.mxu0 %v2665_v57 }
 0x564   :  { %v1103_v4 = vpop.permute.xlu1 %1102  ;;  %v1101_v5 = vpop.permute.xlu0 %1100 }
 0x568   :  { %v1107_v6 = vpop.permute.xlu1 %1106  ;;  %v1105_v7 = vpop.permute.xlu0 %1104 }
 0x569   :  { %v1111_v9 = vsel %vm1023_vm9, %v1107_v6, %v1103_v4  ;;  %v1110_v56 = vsel %vm1023_vm9, %v1105_v7, %v1101_v5  ;;  %v1109_v13 = vsel %vm1023_vm9, %v1103_v4, %v1107_v6  ;;  %v1108_v62 = vsel %vm1023_vm9, %v1101_v5, %v1105_v7  ;;  %v2679_v4 = vld [vmem:[#allocation4 + $0xf4] ss:$8 sps:$4 sm:$0xff]   ;;  %v2677_v5 = vld [vmem:[#allocation4 + $0xf0] ss:$8 sps:$4 sm:$0xff]   ;;  %v2682_v6 = vld [vmem:[#allocation4 + $0x104] ss:$8 sps:$4 sm:$0xff]  }
 0x56a   :  { %v1114_v59 = vadd.f32 %v1111_v9, %v1098_v58  ;;  %v1112_v61 = vadd.f32 %v1110_v56, %v1096_v60  ;;  %v1115_v12 = vadd.f32 %v1109_v13, %v1099_v1  ;;  %v1113_v14 = vadd.f32 %v1108_v62, %v1097_v3  ;;  %v2670_v58 = vld [vmem:[#allocation4 + $0xc4] ss:$8 sps:$4 sm:$0xff]   ;;  %v2668_v60 = vld [vmem:[#allocation4 + $0xc0] ss:$8 sps:$4 sm:$0xff]  }
 0x56b   :  { %1844 = vmatprep.subr.bf16.mxu0 %v2670_v58  ;;  %v2676_v1 = vld [vmem:[#allocation4 + $0xe4] ss:$8 sps:$4 sm:$0xff]   ;;  %v2674_v3 = vld [vmem:[#allocation4 + $0xe0] ss:$8 sps:$4 sm:$0xff]  }
 0x56c   :  { %1118 = vrot.lane.b32.xlu1 %v1114_v59, %s2834_s25  ;;  %1116 = vrot.lane.b32.xlu0 %v1112_v61, %s2834_s25 }
 0x56d   :  { %1845 = vmatpush1.bf16.msra.mxu0 %v2668_v60 }
 0x56e   :  { %1846 = vmatprep.subr.bf16.mxu0 %v2673_v63 }
 0x570   :  { %1122 = vrot.lane.b32.xlu1 %v1115_v12, %s2834_s25  ;;  %1120 = vrot.lane.b32.xlu0 %v1113_v14, %s2834_s25 }
 0x571   :  { %1847 = vmatpush1.bf16.msra.mxu0 %v2671_v0 }
 0x572   :  { %1848 = vmatprep.subr.bf16.mxu0 %v2676_v1 }
 0x575   :  { %1849 = vmatpush1.bf16.msra.mxu0 %v2674_v3 }
 0x576   :  { %1850 = vmatprep.subr.bf16.mxu0 %v2679_v4 }
 0x579   :  { %1851 = vmatpush1.bf16.msra.mxu0 %v2677_v5 }
 0x57a   :  { %1863 = vmatprep.subr.bf16.mxu0 %v2682_v6 }
 0x5de   :  { %v1119_v20 = vpop.permute.xlu1 %1118  ;;  %v1117_v22 = vpop.permute.xlu0 %1116 }
 0x5e2   :  { %v1123_v26 = vpop.permute.xlu1 %1122  ;;  %v1121_v27 = vpop.permute.xlu0 %1120 }
 0x5e3   :  { %v1127_v29 = vsel %vm1040_vm10, %v1123_v26, %v1119_v20  ;;  %v1126_v30 = vsel %vm1040_vm10, %v1121_v27, %v1117_v22  ;;  %v1125_v34 = vsel %vm1040_vm10, %v1119_v20, %v1123_v26  ;;  %v1124_v35 = vsel %vm1040_vm10, %v1117_v22, %v1121_v27 }
 0x5e4   :  { %v3191_v32 = vadd.f32 %v1127_v29, %v1114_v59  ;;  %v3193_v33 = vadd.f32 %v1126_v30, %v1112_v61  ;;  %v1131_v18 = vadd.f32 %v1125_v34, %v1115_v12  ;;  %v1129_v21 = vadd.f32 %v1124_v35, %v1113_v14 }
 0x5e5   :  { %v2836_v30 = vmov 1966171168  }
 0x5e6   :  { %1134 = vrot.lane.b32.xlu1 %v3191_v32, %s2835_s26  ;;  %1132 = vrot.lane.b32.xlu0 %v3193_v33, %s2835_s26  ;;  %v1164_v31 = vunpack.c.l.s4 %v2836_v30  ;;  %v2700_v30 = vld [vmem:[#allocation4 + $0x164] ss:$8 sps:$4 sm:$0xff]  }
 0x5e8   :  { %v1165_v34 = vunpack.c.0.s8 %v1164_v31  ;;  %v2698_v31 = vld [vmem:[#allocation4 + $0x160] ss:$8 sps:$4 sm:$0xff]  }
 0x5ea   :  { %1138 = vrot.lane.b32.xlu1 %v1131_v18, %s2835_s26  ;;  %1136 = vrot.lane.b32.xlu0 %v1129_v21, %s2835_s26 }
 0x658   :  { %v1135_v7 = vpop.permute.xlu1 %1134  ;;  %v1133_v9 = vpop.permute.xlu0 %1132 }
 0x65c   :  { %v1139_v56 = vpop.permute.xlu1 %1138  ;;  %v1137_v59 = vpop.permute.xlu0 %1136 }
 0x65d   :  { %v1141_v61 = vsel %vm1057_vm11, %v1135_v7, %v1139_v56  ;;  %v1143_v10 = vsel %vm1057_vm11, %v1139_v56, %v1135_v7  ;;  %v1140_v11 = vsel %vm1057_vm11, %v1133_v9, %v1137_v59  ;;  %v1142_v13 = vsel %vm1057_vm11, %v1137_v59, %v1133_v9 }
 0x65e   :  { %v1146_v62 = vadd.f32 %v1143_v10, %v3191_v32  ;;  %v1147_v2 = vadd.f32 %v1141_v61, %v1131_v18  ;;  %v1144_v12 = vadd.f32 %v1142_v13, %v3193_v33  ;;  %v1145_v14 = vadd.f32 %v1140_v11, %v1129_v21  ;;  %v1194_v21 = vld [vmem:[%s3448_s5] sm:$0x3] }
 0x65f   :  { %v3216_v32 = vsub.s32 %v1165_v34, %v2965_v52  ;;  %v1199_v51 = vrot.slane %v1194_v21, %v2968_v53  ;;  %v1203_v38 = vrot.slane %v1194_v21, %v2974_v55  ;;  %v2680_v61 = vld [vmem:[#allocation4 + $0x100] ss:$8 sps:$4 sm:$0xff]   ;;  %v2703_v34 = vld [vmem:[#allocation4 + $0x174] ss:$8 sps:$4 sm:$0xff]   ;;  %v2712_v21 = vld [vmem:[#allocation4 + $0x1a4] ss:$8 sps:$4 sm:$0xff]  }
 0x660   :  { %v1149_v15 = vadd.f32 %v1147_v2, %v1146_v62  ;;  %v1148_v16 = vadd.f32 %v1145_v14, %v1144_v12  ;;  %v2685_v62 = vld [vmem:[#allocation4 + $0x114] ss:$8 sps:$4 sm:$0xff]   ;;  %v2692_v52 = vld [vmem:[#allocation4 + $0x140] ss:$8 sps:$4 sm:$0xff]  }
 0x662   :  { %v1150_v19 = vadd.f32 %v1149_v15, %v1148_v16 }
 0x664   :  { %v1151_v20 = vrot.slane %v1150_v19, 4 }
 0x666   :  { %v1152_v22 = vadd.f32 %v1151_v20, %v1150_v19  ;;  %v2683_v20 = vld [vmem:[#allocation4 + $0x110] ss:$8 sps:$4 sm:$0xff]  }
 0x668   :  { %v1153_v23 = vrot.slane %v1152_v22, 2 }
 0x66a   :  { %v1154_v25 = vadd.f32 %v1153_v23, %v1152_v22  ;;  %v2688_v23 = vld [vmem:[#allocation4 + $0x124] ss:$8 sps:$4 sm:$0xff]  }
 0x66c   :  { %v1155_v26 = vrot.slane %v1154_v25, 1 }
 0x66e   :  { %v1156_v27 = vadd.f32 %v1155_v26, %v1154_v25  ;;  %v2686_v25 = vld [vmem:[#allocation4 + $0x120] ss:$8 sps:$4 sm:$0xff]   ;;  %v2689_v26 = vld [vmem:[#allocation4 + $0x130] ss:$8 sps:$4 sm:$0xff]  }
 0x670   :  { %v1157_v28 = vmul.f32 0.001953125, %v1156_v27  ;;  %v2694_v27 = vld [vmem:[#allocation4 + $0x144] ss:$8 sps:$4 sm:$0xff]  }
 0x672   :  { %v1159_v29 = vadd.f32 1e-05, %v1157_v28  ;;  %v2697_v28 = vld [vmem:[#allocation4 + $0x154] ss:$8 sps:$4 sm:$0xff]  }
 0x674   :  { %2776 = vrsqrt.f32 %v1159_v29  ;;  %v2695_v29 = vld [vmem:[#allocation4 + $0x150] ss:$8 sps:$4 sm:$0xff]  }
 0x67e   :  { %v2777_v33 = vpop.eup %2776 }
 0x67f   :  { %v1162_v35 = vcombine.low %v2777_v33, %v2777_v33  ;;  %v2701_v33 = vld [vmem:[#allocation4 + $0x170] ss:$8 sps:$4 sm:$0xff]  }
 0x681   :  { %v1169_v36 = vrot.slane %v1162_v35, %v3216_v32  ;;  %v2706_v35 = vld [vmem:[#allocation4 + $0x184] ss:$8 sps:$4 sm:$0xff]  }
 0x683   :  { %v1176_v18 = vrot.slane %v1169_v36, %v3216_v32  ;;  %v2704_v36 = vld [vmem:[#allocation4 + $0x180] ss:$8 sps:$4 sm:$0xff]  }
 0x685   :  { %v1178_v42 = vmul.f32 %v1176_v18, %v1158_v37  ;;  %v2709_v37 = vld [vmem:[#allocation4 + $0x194] ss:$8 sps:$4 sm:$0xff]   ;;  %v2707_v18 = vld [vmem:[#allocation4 + $0x190] ss:$8 sps:$4 sm:$0xff]  }
 0x687   :  { %v1183_v43 = vrot.slane %v1178_v42, %v2968_v53  ;;  %v1187_v46 = vrot.slane %v1178_v42, %v2974_v55  ;;  %v2710_v42 = vld [vmem:[#allocation4 + $0x1a0] ss:$8 sps:$4 sm:$0xff]  }
 0x689   :  { %v1191_v40 = vmul.f32 %v1187_v46, %v3153_v48  ;;  %v1193_v49 = vmul.f32 %v1187_v46, %v3150_v47  ;;  %v1190_v41 = vmul.f32 %v1183_v43, %v3143_v45  ;;  %v1192_v50 = vmul.f32 %v1183_v43, %v3140_v44  ;;  %v2715_v43 = vld [vmem:[#allocation4 + $0x1b4] ss:$8 sps:$4 sm:$0xff]   ;;  %v2713_v46 = vld [vmem:[#allocation4 + $0x1b0] ss:$8 sps:$4 sm:$0xff]  }
 0x68b   :  { %v1207_v54 = vadd.f32 %v1203_v38, %v1191_v40  ;;  %v1209_v39 = vadd.f32 %v1203_v38, %v1193_v49  ;;  %v1206_v57 = vadd.f32 %v1199_v51, %v1190_v41  ;;  %v1208_v58 = vadd.f32 %v1199_v51, %v1192_v50  ;;  %v2718_v51 = vld [vmem:[#allocation4 + $0x1c4] ss:$8 sps:$4 sm:$0xff]   ;;  %v2716_v38 = vld [vmem:[#allocation4 + $0x1c0] ss:$8 sps:$4 sm:$0xff]   ;;  %v2721_v40 = vld [vmem:[#allocation4 + $0x1d4] ss:$8 sps:$4 sm:$0xff]  }
 0x68c   :  { %v2719_v49 = vld [vmem:[#allocation4 + $0x1d0] ss:$8 sps:$4 sm:$0xff]   ;;  %v2724_v41 = vld [vmem:[#allocation4 + $0x1e4] ss:$8 sps:$4 sm:$0xff]   ;;  %v2722_v50 = vld [vmem:[#allocation4 + $0x1e0] ss:$8 sps:$4 sm:$0xff]  }
 0x68d   :  { %v1211_v60 = vmax.f32 %v1207_v54, 0.0  ;;  %v1213_v63 = vmax.f32 %v1209_v39, 0.0  ;;  %v3234_v0 = vmax.f32 %v1206_v57, 0.0  ;;  %v3236_v1 = vmax.f32 %v1208_v58, 0.0  ;;  %v2727_v54 = vld [vmem:[#allocation4 + $0x1f4] ss:$8 sps:$4 sm:$0xff]  }
 0x68e   :  { %v2725_v39 = vld [vmem:[#allocation4 + $0x1f0] ss:$8 sps:$4 sm:$0xff]   ;;  %v2730_v57 = vld [vmem:[#allocation4 + $0x204] ss:$8 sps:$4 sm:$0xff]   ;;  %v2728_v58 = vld [vmem:[#allocation4 + $0x200] ss:$8 sps:$4 sm:$0xff]  }
 0x68f   :  { %v1215_v3 = vrot.slane %v1211_v60, 7  ;;  %v1217_v4 = vrot.slane %v1213_v63, 7  ;;  %v1214_v48 = vrot.slane %v3234_v0, 7  ;;  %v1216_v47 = vrot.slane %v3236_v1, 7 }
 0x690   :  { %v1240_v45 = vpack.c.bf16 %v3236_v1, %v3234_v0  ;;  %v1227_v44 = vrot.slane %v1211_v60, 1  ;;  %v1229_v5 = vrot.slane %v1213_v63, 1  ;;  %v1226_v12 = vrot.slane %v3234_v0, 1  ;;  %v2740_v0 = vld [vmem:[#allocation4 + $0x240] ss:$8 sps:$4 sm:$0xff]  }
 0x691   :  { %v1219_v6 = vsel %vm255_vm1, %v1215_v3, %v1217_v4  ;;  %v1221_v7 = vsel %vm255_vm1, %v1217_v4, %v1215_v3  ;;  %v1218_v9 = vsel %vm255_vm1, %v1214_v48, %v1216_v47  ;;  %v1220_v56 = vsel %vm255_vm1, %v1216_v47, %v1214_v48  ;;  %v2736_v3 = vld [vmem:[#allocation4 + $0x224] ss:$8 sps:$4 sm:$0xff]   ;;  %v2734_v4 = vld [vmem:[#allocation4 + $0x220] ss:$8 sps:$4 sm:$0xff]   ;;  %v2739_v48 = vld [vmem:[#allocation4 + $0x234] ss:$8 sps:$4 sm:$0xff]  }
 0x692   :  { %v2413_v59 = vpack.c.bf16 %v1219_v6, %v1221_v7  ;;  %v2418_v10 = vpack.c.bf16 %v1218_v9, %v1220_v56  ;;  %v3252_v11 = vsel %vm272_vm0, %v1227_v44, %v1229_v5  ;;  %v3256_v13 = vsel %vm272_vm0, %v1229_v5, %v1227_v44  ;;  %v2737_v47 = vld [vmem:[#allocation4 + $0x230] ss:$8 sps:$4 sm:$0xff]   ;;  %v2742_v44 = vld [vmem:[#allocation4 + $0x244] ss:$8 sps:$4 sm:$0xff]   ;;  %v2746_v6 = vld [vmem:[#allocation4 + $0x260] ss:$8 sps:$4 sm:$0xff]  }
 0x693   :  { %v2423_v2 = vpack.c.bf16 %v3256_v13, %v3252_v11  ;;  %v1228_v14 = vrot.slane %v3236_v1, 1  ;;  %v1241_v15 = vpack.c.bf16 %v1213_v63, %v1211_v60  ;;  %v2733_v60 = vld [vmem:[#allocation4 + $0x214] ss:$8 sps:$4 sm:$0xff]   ;;  %v2731_v63 = vld [vmem:[#allocation4 + $0x210] ss:$8 sps:$4 sm:$0xff]  }
 0x694   :  { %2414 = vmatprep.mubr.msk.bf16.mxu0 %vm3029_vm4, %v2413_v59  ;;  %v2745_v1 = vld [vmem:[#allocation4 + $0x254] ss:$8 sps:$4 sm:$0xff]   ;;  %v2748_v5 = vld [vmem:[#allocation4 + $0x264] ss:$8 sps:$4 sm:$0xff]   ;;  %v2749_v9 = vld [vmem:[#allocation4 + $0x270] ss:$8 sps:$4 sm:$0xff]  }
 0x695   :  { %2419 = vmatmul.mubr.msk.bf16.vlgmr.msra.gmra.mrb[4].mxu0 %vm3029_vm4, %v2418_v10  ;;  %v3268_v16 = vsel %vm272_vm0, %v1226_v12, %v1228_v14  ;;  %v3272_v19 = vsel %vm272_vm0, %v1228_v14, %v1226_v12  ;;  %v2751_v7 = vld [vmem:[#allocation4 + $0x274] ss:$8 sps:$4 sm:$0xff]   ;;  %v2754_v56 = vld [vmem:[#allocation4 + $0x284] ss:$8 sps:$4 sm:$0xff]   ;;  %v2752_v59 = vld [vmem:[#allocation4 + $0x280] ss:$8 sps:$4 sm:$0xff]  }
 0x696   :  { %1864 = vmatpush1.bf16.msra.mxu0 %v2680_v61  ;;  %1895 = vmatprep.mubr.bf16.mxu0 %v1241_v15  ;;  %v2428_v22 = vpack.c.bf16 %v3272_v19, %v3268_v16  ;;  %v2757_v61 = vld [vmem:[#allocation4 + $0x294] ss:$8 sps:$4 sm:$0xff]   ;;  %v2755_v10 = vld [vmem:[#allocation4 + $0x290] ss:$8 sps:$4 sm:$0xff]   ;;  %v2760_v11 = vld [vmem:[#allocation4 + $0x2a4] ss:$8 sps:$4 sm:$0xff]  }
 0x697   :  { %1865 = vmatprep.subr.bf16.mxu0 %v2685_v62  ;;  %v2758_v13 = vld [vmem:[#allocation4 + $0x2a0] ss:$8 sps:$4 sm:$0xff]   ;;  %v2763_v62 = vld [vmem:[#allocation4 + $0x2b4] ss:$8 sps:$4 sm:$0xff]   ;;  %v2766_v12 = vld [vmem:[#allocation4 + $0x2c4] ss:$8 sps:$4 sm:$0xff]  }
 0x698   :  { %v2764_v14 = vld [vmem:[#allocation4 + $0x2c0] ss:$8 sps:$4 sm:$0xff]   ;;  %v2769_v15 = vld [vmem:[#allocation4 + $0x2d4] ss:$8 sps:$4 sm:$0xff]  }
 0x69a   :  { %1866 = vmatpush1.bf16.msra.mxu0 %v2683_v20  ;;  %v2767_v20 = vld [vmem:[#allocation4 + $0x2d0] ss:$8 sps:$4 sm:$0xff]  }
 0x69b   :  { %1867 = vmatprep.subr.bf16.mxu0 %v2688_v23  ;;  %v2772_v23 = vld [vmem:[#allocation4 + $0x2e4] ss:$8 sps:$4 sm:$0xff]  }
 0x69e   :  { %1868 = vmatpush1.bf16.msra.mxu0 %v2686_v25  ;;  %v2770_v25 = vld [vmem:[#allocation4 + $0x2e0] ss:$8 sps:$4 sm:$0xff]  }
 0x69f   :  { %1869 = vmatprep.subr.bf16.mxu0 %v2691_v24  ;;  %v2775_v24 = vld [vmem:[#allocation4 + $0x2f4] ss:$8 sps:$4 sm:$0xff]  }
 0x6a2   :  { %1870 = vmatpush1.bf16.msra.mxu0 %v2689_v26  ;;  %v2773_v26 = vld [vmem:[#allocation4 + $0x2f0] ss:$8 sps:$4 sm:$0xff]  }
 0x6a3   :  { %1871 = vmatprep.subr.bf16.mxu0 %v2694_v27 }
 0x6a6   :  { %1872 = vmatpush1.bf16.msra.mxu0 %v2692_v52 }
 0x6a7   :  { %1873 = vmatprep.subr.bf16.mxu0 %v2697_v28 }
 0x6aa   :  { %1874 = vmatpush1.bf16.msra.mxu0 %v2695_v29 }
 0x6ab   :  { %1875 = vmatprep.subr.bf16.mxu0 %v2700_v30 }
 0x6ae   :  { %1876 = vmatpush1.bf16.msra.mxu0 %v2698_v31 }
 0x6af   :  { %1877 = vmatprep.subr.bf16.mxu0 %v2703_v34 }
 0x6b2   :  { %1878 = vmatpush1.bf16.msra.mxu0 %v2701_v33 }
 0x6b3   :  { %1879 = vmatprep.subr.bf16.mxu0 %v2706_v35 }
 0x6b6   :  { %1880 = vmatpush1.bf16.msra.mxu0 %v2704_v36 }
 0x6b7   :  { %1881 = vmatprep.subr.bf16.mxu0 %v2709_v37 }
 0x6ba   :  { %1882 = vmatpush1.bf16.msra.mxu0 %v2707_v18 }
 0x6bb   :  { %1883 = vmatprep.subr.bf16.mxu0 %v2712_v21 }
 0x6be   :  { %1884 = vmatpush1.bf16.msra.mxu0 %v2710_v42 }
 0x6bf   :  { %1885 = vmatprep.subr.bf16.mxu0 %v2715_v43 }
 0x6c2   :  { %1886 = vmatpush1.bf16.msra.mxu0 %v2713_v46 }
 0x6c3   :  { %1887 = vmatprep.subr.bf16.mxu0 %v2718_v51 }
 0x6c6   :  { %1888 = vmatpush1.bf16.msra.mxu0 %v2716_v38 }
 0x6c7   :  { %1889 = vmatprep.subr.bf16.mxu0 %v2721_v40 }
 0x6ca   :  { %1890 = vmatpush1.bf16.msra.mxu0 %v2719_v49 }
 0x6cb   :  { %1891 = vmatprep.subr.bf16.mxu0 %v2724_v41 }
 0x6ce   :  { %1892 = vmatpush1.bf16.msra.mxu0 %v2722_v50 }
 0x6cf   :  { %1893 = vmatprep.subr.bf16.mxu0 %v2727_v54 }
 0x6d2   :  { %1894 = vmatpush1.bf16.msra.mxu0 %v2725_v39 }
 0x6d3   :  { %1906 = vmatprep.subr.bf16.mxu0 %v2730_v57 }
 0x6d5   :  { %1896 = vmatmul.mubr.bf16.vlgmr.msra.gmra.mrb[4].mxu0 %v1240_v45  ;;  %v2743_v45 = vld [vmem:[#allocation4 + $0x250] ss:$8 sps:$4 sm:$0xff]  }
 0x6d6   :  { %1907 = vmatpush1.bf16.msra.mxu0 %v2728_v58  ;;  %2424 = vmatprep.mubr.msk.bf16.mxu0 %vm3051_vm7, %v2423_v2  ;;  %v2761_v2 = vld [vmem:[#allocation4 + $0x2b0] ss:$8 sps:$4 sm:$0xff]  }
 0x6d7   :  { %1908 = vmatprep.subr.bf16.mxu0 %v2733_v60 }
 0x6da   :  { %1909 = vmatpush1.bf16.msra.mxu0 %v2731_v63 }
 0x6db   :  { %1910 = vmatprep.subr.bf16.mxu0 %v2736_v3 }
 0x6de   :  { %1911 = vmatpush1.bf16.msra.mxu0 %v2734_v4 }
 0x6df   :  { %1912 = vmatprep.subr.bf16.mxu0 %v2739_v48 }
 0x6e2   :  { %1913 = vmatpush1.bf16.msra.mxu0 %v2737_v47 }
 0x6e3   :  { %1914 = vmatprep.subr.bf16.mxu0 %v2742_v44 }
 0x6e6   :  { %1915 = vmatpush1.bf16.msra.mxu0 %v2740_v0 }
 0x6e7   :  { %1916 = vmatprep.subr.bf16.mxu0 %v2745_v1 }
 0x6ea   :  { %1917 = vmatpush1.bf16.msra.mxu0 %v2743_v45 }
 0x6eb   :  { %1918 = vmatprep.subr.bf16.mxu0 %v2748_v5 }
 0x6ee   :  { %1919 = vmatpush1.bf16.msra.mxu0 %v2746_v6 }
 0x6ef   :  { %1920 = vmatprep.subr.bf16.mxu0 %v2751_v7 }
 0x6f2   :  { %1921 = vmatpush1.bf16.msra.mxu0 %v2749_v9 }
 0x6f3   :  { %1922 = vmatprep.subr.bf16.mxu0 %v2754_v56 }
 0x6f6   :  { %1923 = vmatpush1.bf16.msra.mxu0 %v2752_v59 }
 0x6f7   :  { %1924 = vmatprep.subr.bf16.mxu0 %v2757_v61 }
 0x6fa   :  { %1925 = vmatpush1.bf16.msra.mxu0 %v2755_v10 }
 0x6fb   :  { %1926 = vmatprep.subr.bf16.mxu0 %v2760_v11 }
 0x6fe   :  { %1927 = vmatpush1.bf16.msra.mxu0 %v2758_v13 }
 0x6ff   :  { %1928 = vmatprep.subr.bf16.mxu0 %v2763_v62 }
 0x702   :  { %1929 = vmatpush1.bf16.msra.mxu0 %v2761_v2 }
 0x703   :  { %1930 = vmatprep.subr.bf16.mxu0 %v2766_v12 }
 0x706   :  { %1931 = vmatpush1.bf16.msra.mxu0 %v2764_v14 }
 0x707   :  { %1932 = vmatprep.subr.bf16.mxu0 %v2769_v15 }
 0x70a   :  { %1933 = vmatpush1.bf16.msra.mxu0 %v2767_v20 }
 0x70b   :  { %1934 = vmatprep.subr.bf16.mxu0 %v2772_v23 }
 0x70e   :  { %1935 = vmatpush1.bf16.msra.mxu0 %v2770_v25 }
 0x70f   :  { %1936 = vmatprep.subr.bf16.mxu0 %v2775_v24 }
 0x712   :  { %1937 = vmatpush1.bf16.msra.mxu0 %v2773_v26 }
 0x715   :  { %2429 = vmatmul.mubr.msk.bf16.vlgmr.msra.gmra.mrb[4].mxu0 %vm3051_vm7, %v2428_v22 }
 0x7e8   :  { %v3289_v27 = vpop.f32.mrb[4].mxu0 }
 0x7e9   :  { %1949 = vrot.lane.b32.xlu0 %v3289_v27, %s2830_s20  ;;  %v3293_v52 = vpop.f32.mrb[5].mxu0 }
 0x7ea   :  { %v3295_v28 = vpop.f32.mrb[6].mxu0 }
 0x7eb   :  { %1951 = vrot.lane.b32.xlu1 %v3295_v28, %s2830_s20  ;;  %v3299_v29 = vpop.f32.mrb[7].mxu0 }
 0x7ed   :  { %1953 = vrot.lane.b32.xlu0 %v3293_v52, %s2830_s20 }
 0x7ef   :  { %1955 = vrot.lane.b32.xlu1 %v3299_v29, %s2830_s20 }
 0x85b   :  { %v1950_v8 = vpop.permute.xlu0 %1949 }
 0x85d   :  { %v1952_v16 = vpop.permute.xlu1 %1951 }
 0x85f   :  { %v1954_v19 = vpop.permute.xlu0 %1953 }
 0x860   :  { %v1959_v22 = vsel %vm1006_vm8, %v1954_v19, %v1950_v8  ;;  %v1957_v34 = vsel %vm1006_vm8, %v1950_v8, %v1954_v19 }
 0x861   :  { %v1961_v30 = vadd.f32 %v1959_v22, %v3289_v27  ;;  %v1956_v31 = vpop.permute.xlu1 %1955  ;;  %v1962_v37 = vadd.f32 %v1957_v34, %v3293_v52 }
 0x862   :  { %v1960_v33 = vsel %vm1006_vm8, %v1956_v31, %v1952_v16  ;;  %v1958_v36 = vsel %vm1006_vm8, %v1952_v16, %v1956_v31 }
 0x863   :  { %v1963_v35 = vadd.f32 %v1960_v33, %v3295_v28  ;;  %1965 = vrot.lane.b32.xlu0 %v1961_v30, %s2833_s2  ;;  %v1964_v18 = vadd.f32 %v1958_v36, %v3299_v29 }
 0x865   :  { %1967 = vrot.lane.b32.xlu1 %v1963_v35, %s2833_s2 }
 0x867   :  { %1969 = vrot.lane.b32.xlu0 %v1962_v37, %s2833_s2 }
 0x869   :  { %1971 = vrot.lane.b32.xlu1 %v1964_v18, %s2833_s2 }
 0x8d5   :  { %v1966_v21 = vpop.permute.xlu0 %1965 }
 0x8d7   :  { %v1968_v42 = vpop.permute.xlu1 %1967 }
 0x8d9   :  { %v1970_v43 = vpop.permute.xlu0 %1969 }
 0x8da   :  { %v1975_v46 = vsel %vm1023_vm9, %v1970_v43, %v1966_v21  ;;  %v1973_v40 = vsel %vm1023_vm9, %v1966_v21, %v1970_v43 }
 0x8db   :  { %v1977_v51 = vadd.f32 %v1975_v46, %v1961_v30  ;;  %v1972_v38 = vpop.permute.xlu1 %1971  ;;  %v1978_v54 = vadd.f32 %v1973_v40, %v1962_v37 }
 0x8dc   :  { %v1976_v49 = vsel %vm1023_vm9, %v1972_v38, %v1968_v42  ;;  %v1974_v50 = vsel %vm1023_vm9, %v1968_v42, %v1972_v38 }
 0x8dd   :  { %v1979_v41 = vadd.f32 %v1976_v49, %v1963_v35  ;;  %1981 = vrot.lane.b32.xlu0 %v1977_v51, %s2834_s25  ;;  %v1980_v39 = vadd.f32 %v1974_v50, %v1964_v18 }
 0x8df   :  { %1983 = vrot.lane.b32.xlu1 %v1979_v41, %s2834_s25 }
 0x8e1   :  { %1985 = vrot.lane.b32.xlu0 %v1978_v54, %s2834_s25 }
 0x8e3   :  { %1987 = vrot.lane.b32.xlu1 %v1980_v39, %s2834_s25 }
 0x94f   :  { %v1982_v57 = vpop.permute.xlu0 %1981 }
 0x951   :  { %v1984_v58 = vpop.permute.xlu1 %1983 }
 0x953   :  { %v1986_v60 = vpop.permute.xlu0 %1985 }
 0x954   :  { %v1991_v63 = vsel %vm1040_vm10, %v1986_v60, %v1982_v57  ;;  %v1989_v48 = vsel %vm1040_vm10, %v1982_v57, %v1986_v60 }
 0x955   :  { %v1993_v3 = vadd.f32 %v1991_v63, %v1977_v51  ;;  %v1988_v4 = vpop.permute.xlu1 %1987  ;;  %v1994_v1 = vadd.f32 %v1989_v48, %v1978_v54 }
 0x956   :  { %v1992_v47 = vsel %vm1040_vm10, %v1988_v4, %v1984_v58  ;;  %v1990_v0 = vsel %vm1040_vm10, %v1984_v58, %v1988_v4 }
 0x957   :  { %v1995_v44 = vadd.f32 %v1992_v47, %v1979_v41  ;;  %1997 = vrot.lane.b32.xlu0 %v1993_v3, %s2835_s26  ;;  %v1996_v45 = vadd.f32 %v1990_v0, %v1980_v39 }
 0x959   :  { %1999 = vrot.lane.b32.xlu1 %v1995_v44, %s2835_s26 }
 0x95b   :  { %2001 = vrot.lane.b32.xlu0 %v1994_v1, %s2835_s26 }
 0x95d   :  { %2003 = vrot.lane.b32.xlu1 %v1996_v45, %s2835_s26 }
 0x9c9   :  { %v1998_v5 = vpop.permute.xlu0 %1997 }
 0x9cb   :  { %v2000_v6 = vpop.permute.xlu1 %1999 }
 0x9cd   :  { %v2002_v7 = vpop.permute.xlu0 %2001 }
 0x9ce   :  { %v2005_v9 = vsel %vm1057_vm11, %v1998_v5, %v2002_v7  ;;  %v2007_v56 = vsel %vm1057_vm11, %v2002_v7, %v1998_v5 }
 0x9cf   :  { %v2009_v59 = vadd.f32 %v2007_v56, %v1993_v3  ;;  %v2010_v61 = vadd.f32 %v2005_v9, %v1994_v1  ;;  %v2004_v10 = vpop.permute.xlu1 %2003 }
 0x9d0   :  { %v2006_v11 = vsel %vm1057_vm11, %v2000_v6, %v2004_v10  ;;  %v2008_v13 = vsel %vm1057_vm11, %v2004_v10, %v2000_v6 }
 0x9d1   :  { %v2011_v62 = vadd.f32 %v2008_v13, %v1995_v44  ;;  %v2012_v2 = vadd.f32 %v2006_v11, %v1996_v45  ;;  %v2013_v12 = vadd.f32 %v2010_v61, %v2009_v59 }
 0x9d3   :  { %v2014_v14 = vadd.f32 %v2012_v2, %v2011_v62 }
 0x9d5   :  { %v2015_v15 = vadd.f32 %v2014_v14, %v2013_v12 }
 0x9d7   :  { %v2016_v20 = vrot.slane %v2015_v15, 4 }
 0x9d9   :  { %v2017_v23 = vadd.f32 %v2016_v20, %v2015_v15 }
 0x9db   :  { %v2018_v25 = vrot.slane %v2017_v23, 2 }
 0x9dd   :  { %v2019_v24 = vadd.f32 %v2018_v25, %v2017_v23 }
 0x9df   :  { %v2020_v26 = vrot.slane %v2019_v24, 1 }
 0x9e1   :  { %v2021_v8 = vadd.f32 %v2020_v26, %v2019_v24 }
 0x9e3   :  { %v2022_v16 = vmul.f32 0.001953125, %v2021_v8 }
 0x9e5   :  { %v3354_v19 = vsub.f32 %v3295_v28, %v2022_v16  ;;  %v3357_v22 = vsub.f32 %v3289_v27, %v2022_v16  ;;  %v3364_v34 = vsub.f32 %v3299_v29, %v2022_v16  ;;  %v3367_v33 = vsub.f32 %v3293_v52, %v2022_v16 }
 0x9e7   :  { %v2029_v30 = vmul.f32 %v3354_v19, %v3354_v19  ;;  %v2027_v31 = vmul.f32 %v3357_v22, %v3357_v22  ;;  %v2030_v27 = vmul.f32 %v3364_v34, %v3364_v34  ;;  %v2028_v28 = vmul.f32 %v3367_v33, %v3367_v33 }
 0x9e9   :  { %2033 = vrot.lane.b32.xlu1 %v2029_v30, %s2830_s20  ;;  %2031 = vrot.lane.b32.xlu0 %v2027_v31, %s2830_s20 }
 0x9ed   :  { %2037 = vrot.lane.b32.xlu1 %v2030_v27, %s2830_s20  ;;  %2035 = vrot.lane.b32.xlu0 %v2028_v28, %s2830_s20 }
 0xa5b   :  { %v2034_v35 = vpop.permute.xlu1 %2033  ;;  %v2032_v29 = vpop.permute.xlu0 %2031 }
 0xa5f   :  { %v2038_v36 = vpop.permute.xlu1 %2037  ;;  %v2036_v37 = vpop.permute.xlu0 %2035 }
 0xa60   :  { %v2042_v52 = vsel %vm1006_vm8, %v2038_v36, %v2034_v35  ;;  %v2041_v18 = vsel %vm1006_vm8, %v2036_v37, %v2032_v29  ;;  %v2040_v43 = vsel %vm1006_vm8, %v2034_v35, %v2038_v36  ;;  %v2039_v46 = vsel %vm1006_vm8, %v2032_v29, %v2036_v37 }
 0xa61   :  { %v2045_v21 = vadd.f32 %v2042_v52, %v2029_v30  ;;  %v2043_v42 = vadd.f32 %v2041_v18, %v2027_v31  ;;  %v2046_v51 = vadd.f32 %v2040_v43, %v2030_v27  ;;  %v2044_v38 = vadd.f32 %v2039_v46, %v2028_v28  ;;  %v2105_v18 = vld [vmem:[%s3450_s7] sm:$0x3] }
 0xa63   :  { %2049 = vrot.lane.b32.xlu1 %v2045_v21, %s2833_s2  ;;  %2047 = vrot.lane.b32.xlu0 %v2043_v42, %s2833_s2 }
 0xa67   :  { %2053 = vrot.lane.b32.xlu1 %v2046_v51, %s2833_s2  ;;  %2051 = vrot.lane.b32.xlu0 %v2044_v38, %s2833_s2 }
 0xad5   :  { %v2050_v40 = vpop.permute.xlu1 %2049  ;;  %v2048_v49 = vpop.permute.xlu0 %2047 }
 0xad9   :  { %v2054_v41 = vpop.permute.xlu1 %2053  ;;  %v2052_v50 = vpop.permute.xlu0 %2051 }
 0xada   :  { %v2058_v54 = vsel %vm1023_vm9, %v2054_v41, %v2050_v40  ;;  %v2057_v39 = vsel %vm1023_vm9, %v2052_v50, %v2048_v49  ;;  %v2056_v60 = vsel %vm1023_vm9, %v2050_v40, %v2054_v41  ;;  %v2055_v63 = vsel %vm1023_vm9, %v2048_v49, %v2052_v50 }
 0xadb   :  { %v2061_v57 = vadd.f32 %v2058_v54, %v2045_v21  ;;  %v2059_v58 = vadd.f32 %v2057_v39, %v2043_v42  ;;  %v2062_v3 = vadd.f32 %v2056_v60, %v2046_v51  ;;  %v2060_v4 = vadd.f32 %v2055_v63, %v2044_v38  ;;  %v2141_v42 = vld [vmem:[%s3451_s8] sm:$0x3] }
 0xadc   :  { %v2146_v46 = vrot.slane %v2141_v42, %v2968_v53  ;;  %v2150_v51 = vrot.slane %v2141_v42, %v2974_v55 }
 0xadd   :  { %2065 = vrot.lane.b32.xlu1 %v2061_v57, %s2834_s25  ;;  %2063 = vrot.lane.b32.xlu0 %v2059_v58, %s2834_s25 }
 0xae1   :  { %2069 = vrot.lane.b32.xlu1 %v2062_v3, %s2834_s25  ;;  %2067 = vrot.lane.b32.xlu0 %v2060_v4, %s2834_s25 }
 0xb4f   :  { %v2066_v48 = vpop.permute.xlu1 %2065  ;;  %v2064_v47 = vpop.permute.xlu0 %2063 }
 0xb53   :  { %v2070_v44 = vpop.permute.xlu1 %2069  ;;  %v2068_v0 = vpop.permute.xlu0 %2067 }
 0xb54   :  { %v2074_v1 = vsel %vm1040_vm10, %v2070_v44, %v2066_v48  ;;  %v2073_v45 = vsel %vm1040_vm10, %v2068_v0, %v2064_v47  ;;  %v2072_v7 = vsel %vm1040_vm10, %v2066_v48, %v2070_v44  ;;  %v2071_v9 = vsel %vm1040_vm10, %v2064_v47, %v2068_v0 }
 0xb55   :  { %v2077_v5 = vadd.f32 %v2074_v1, %v2061_v57  ;;  %v2075_v6 = vadd.f32 %v2073_v45, %v2059_v58  ;;  %v2078_v56 = vadd.f32 %v2072_v7, %v2062_v3  ;;  %v2076_v59 = vadd.f32 %v2071_v9, %v2060_v4 }
 0xb57   :  { %2081 = vrot.lane.b32.xlu1 %v2077_v5, %s2835_s26  ;;  %2079 = vrot.lane.b32.xlu0 %v2075_v6, %s2835_s26 }
 0xb5b   :  { %2085 = vrot.lane.b32.xlu1 %v2078_v56, %s2835_s26  ;;  %2083 = vrot.lane.b32.xlu0 %v2076_v59, %s2835_s26 }
 0xbc9   :  { %v2082_v61 = vpop.permute.xlu1 %2081  ;;  %v2080_v10 = vpop.permute.xlu0 %2079 }
 0xbcd   :  { %v2086_v11 = vpop.permute.xlu1 %2085  ;;  %v2084_v13 = vpop.permute.xlu0 %2083 }
 0xbce   :  { %v2088_v62 = vsel %vm1057_vm11, %v2082_v61, %v2086_v11  ;;  %v2090_v2 = vsel %vm1057_vm11, %v2086_v11, %v2082_v61  ;;  %v2087_v12 = vsel %vm1057_vm11, %v2080_v10, %v2084_v13  ;;  %v2089_v14 = vsel %vm1057_vm11, %v2084_v13, %v2080_v10 }
 0xbcf   :  { %v2093_v15 = vadd.f32 %v2090_v2, %v2077_v5  ;;  %v2094_v20 = vadd.f32 %v2088_v62, %v2078_v56  ;;  %v2091_v23 = vadd.f32 %v2089_v14, %v2075_v6  ;;  %v2092_v25 = vadd.f32 %v2087_v12, %v2076_v59 }
 0xbd1   :  { %v2096_v24 = vadd.f32 %v2094_v20, %v2093_v15  ;;  %v2095_v26 = vadd.f32 %v2092_v25, %v2091_v23 }
 0xbd3   :  { %v2097_v8 = vadd.f32 %v2096_v24, %v2095_v26 }
 0xbd5   :  { %v2098_v16 = vrot.slane %v2097_v8, 4 }
 0xbd7   :  { %v2099_v30 = vadd.f32 %v2098_v16, %v2097_v8 }
 0xbd9   :  { %v2100_v31 = vrot.slane %v2099_v30, 2 }
 0xbdb   :  { %v2101_v27 = vadd.f32 %v2100_v31, %v2099_v30 }
 0xbdd   :  { %v2102_v28 = vrot.slane %v2101_v27, 1 }
 0xbdf   :  { %v2103_v35 = vadd.f32 %v2102_v28, %v2101_v27 }
 0xbe1   :  { %v2104_v29 = vmul.f32 0.001953125, %v2103_v35 }
 0xbe3   :  { %v2106_v36 = vadd.f32 1e-05, %v2104_v29 }
 0xbe5   :  { %2778 = vrsqrt.f32 %v2106_v36 }
 0xbef   :  { %v2779_v37 = vpop.eup %2778 }
 0xbf0   :  { %v2109_v52 = vcombine.low %v2779_v37, %v2779_v37 }
 0xbf2   :  { %v2116_v17 = vrot.slane %v2109_v52, %v3216_v32 }
 0xbf4   :  { %v2123_v21 = vrot.slane %v2116_v17, %v3216_v32 }
 0xbf6   :  { %v2125_v43 = vmul.f32 %v2123_v21, %v2105_v18 }
 0xbf8   :  { %v2130_v38 = vrot.slane %v2125_v43, %v2968_v53  ;;  %v2134_v40 = vrot.slane %v2125_v43, %v2974_v55 }
 0xbfa   :  { %v2137_v49 = vmul.f32 %v2130_v38, %v3357_v22  ;;  %v2138_v41 = vmul.f32 %v2134_v40, %v3367_v33  ;;  %v2139_v50 = vmul.f32 %v2130_v38, %v3354_v19  ;;  %v2140_v32 = vmul.f32 %v2134_v40, %v3364_v34 }
 0xbfc   :  { %v2153_v54 = vadd.f32 %v2146_v46, %v2137_v49  ;;  %v2154_v39 = vadd.f32 %v2150_v51, %v2138_v41  ;;  %v2155_v57 = vadd.f32 %v2146_v46, %v2139_v50  ;;  %v2156_v58 = vadd.f32 %v2150_v51, %v2140_v32 }
 0xbfe   :  { %v2157_v60 = vmax.f32 %v2153_v54, 0.0  ;;  %v2158_v63 = vmax.f32 %v2154_v39, 0.0  ;;  %v2159_v3 = vmax.f32 %v2155_v57, 0.0  ;;  %v2160_v4 = vmax.f32 %v2156_v58, 0.0 }
 0xc00   :  { %v2432_v48 = vpack.c.bf16 %v2158_v63, %v2157_v60  ;;  %v2433_v53 = vpack.c.bf16 %v2160_v4, %v2159_v3 }
 0xc02   :  { %2173 = vst [vmem:[%s3452_s9] sm:$0xff] %v2432_v48  ;;  %2174 = vst [vmem:[%s3452_s9 + $0x8] sm:$0xff] %v2433_v53 }
 0xc03   :  { %2179 = vsyncpa [#allocation3], 1 }
 0xc04   :  { %2180 = vsyncpa [#allocation5], 1 }

</bundles_post_ra>
